<compile_context>
chip_gen: v7x
topology: tpu7x:2x2x1
jax: 0.10.0
libtpu: 0.0.40
codegen_flags: <defaults>
</compile_context>

<pallas_src>
import math
import jax
import jax.numpy as jnp
from jax.experimental import pallas as pl
from jax.experimental.pallas import tpu as pltpu

L = 8          # seq_len
N = 8          # batch (must equal L for the module's final torch.matmul to be valid)
E = 32         # in_dim (embed dim)
H = 4          # num_heads
HD = E // H    # head dim


def _dda_kernel(x_ref, dist_ref, w_ref, b_ref, out_ref):
    # x_ref    : (1, L, N, E)  raw torch layout (one instance per grid step)
    # dist_ref : (1, N, L, L)
    # w_ref    : (E, 2E)  fused [Wq^T * 1/sqrt(HD) | Wk^T]   (scale folded at init)
    # b_ref    : (1, 2E)  fused [bq  * 1/sqrt(HD) | bk]
    # out_ref  : (1, N, L, E)
    x_lne = x_ref[0]                                   # (L, N, E) raw layout

    # Batch-first view only for the attention-score path; the final "adjusted @ x"
    # consumes the raw (L, N, E) view directly (torch batched-matmul semantics).
    x_nle = jnp.transpose(x_lne, (1, 0, 2))            # (N, L, E)
    xf = x_nle.reshape(N * L, E)                       # rows ordered n*L + l

    # Fused, pre-scaled Q/K projection: one MXU matmul + one broadcast bias add.
    qk = jnp.dot(xf, w_ref[...], preferred_element_type=jnp.float32) + b_ref[...]  # (N*L, 2E)
    q = qk[:, :E].reshape(N, L, E)                     # already scaled by 1/sqrt(HD)
    k = qk[:, E:].reshape(N, L, E)

    # Gather heads into the batch axis: (H*N, L, HD), batch index = h*N + n.
    qh = jnp.concatenate([q[:, :, h * HD:(h + 1) * HD] for h in range(H)], axis=0)
    kh = jnp.concatenate([k[:, :, h * HD:(h + 1) * HD] for h in range(H)], axis=0)

    # One batched score matmul + ONE softmax pass over all (head, batch) pairs.
    s = jnp.einsum('bid,bjd->bij', qh, kh,
                   preferred_element_type=jnp.float32)          # (H*N, L, L)
    s = s - jnp.max(s, axis=-1, keepdims=True)
    p = jnp.exp(s)
    # Fold the 1/H head-average into the softmax denominator (exact recip keeps 1e-4 tol).
    inv = pl.reciprocal(jnp.sum(p, axis=-1, keepdims=True) * float(H))
    w = p * inv                                                  # softmax / H per head

    # Head average (already scaled by 1/H above): plain sum over the head axis.
    w_avg = jnp.sum(w.reshape(H, N, L, L), axis=0)               # (N, L, L)

    adjusted = w_avg * dist_ref[0]                               # attn_weights * distribution

    # torch.matmul(adjusted (N,L,L), x (L,N,E)) with L == N:
    #   out[n,i,e] = sum_j adjusted[n,i,j] * x_raw[n,j,e]
    out_ref[0] = jnp.einsum('nij,nje->nie', adjusted, x_lne,
                            preferred_element_type=jnp.float32)


def prepare_qk_params(wq, wk, bq, bk):
    """Init-time glue (hoisted out of the per-call path): fuse the torch-layout (out,in)
    Q/K weights + biases into one (E, 2E) / (1, 2E) pair, and fold the 1/sqrt(HD) query
    scale into the Q columns so the kernel does zero extra scaling work."""
    scale = 1.0 / math.sqrt(HD)
    w_fused = jnp.concatenate([wq.T * scale, wk.T], axis=1)              # (E, 2E): q|k cols
    b_fused = jnp.concatenate([bq * scale, bk], axis=0).reshape(1, 2 * E)
    return w_fused, b_fused


def distribution_denoise_attention_batched(xB, distB, w_fused, b_fused):
    """Many independent (x, distribution) instances in one pallas_call.
    xB: (B, L, N, E); distB: (B, N, L, L) -> (B, N, L, E)."""
    B = xB.shape[0]
    return pl.pallas_call(
        _dda_kernel,
        out_shape=jax.ShapeDtypeStruct((B, N, L, E), jnp.float32),
        grid=(B,),
        in_specs=[
            pl.BlockSpec((1, L, N, E), lambda b: (b, 0, 0, 0)),
            pl.BlockSpec((1, N, L, L), lambda b: (b, 0, 0, 0)),
            pl.BlockSpec((E, 2 * E), lambda b: (0, 0)),          # weights resident across grid
            pl.BlockSpec((1, 2 * E), lambda b: (0, 0)),
        ],
        out_specs=pl.BlockSpec((1, N, L, E), lambda b: (b, 0, 0, 0)),
        compiler_params=pltpu.CompilerParams(
            dimension_semantics=("parallel",)),                  # lets v7x split instances over TCs
    )(xB, distB, w_fused, b_fused)


def distribution_denoise_attention(x, distribution, w_fused, b_fused):
    """Single instance, matching the PyTorch module forward. x: (L,N,E); distribution: (N,L,L)."""
    assert L == N, "module's final torch.matmul requires seq_len == batch"
    out = distribution_denoise_attention_batched(x[None], distribution[None], w_fused, b_fused)
    return out[0]


def _reference(x, dist, wq, wk, bq, bk):
    # pure-JAX reference reproducing torch MHA (self-attn, head-averaged weights) semantics
    q = (jnp.einsum('lne,fe->lnf', x, wq) + bq) * (1.0 / math.sqrt(HD))
    k = jnp.einsum('lne,fe->lnf', x, wk) + bk
    qh = q.reshape(L, N, H, HD)
    kh = k.reshape(L, N, H, HD)
    s = jnp.einsum('inhd,jnhd->nhij', qh, kh)
    p = jax.nn.softmax(s, axis=-1)
    w = jnp.mean(p, axis=1)                 # (N, L, L), head-averaged attn_weights
    adj = w * dist
    return jnp.einsum('nij,nje->nie', adj, x)


if __name__ == "__main__":
    key = jax.random.PRNGKey(0)
    k1, k2, k3, k4, k5, k6 = jax.random.split(key, 6)

    x = jax.random.normal(k1, (L, N, E), jnp.float32)
    distribution = jax.nn.softmax(
        jax.random.normal(k2, (N, L, L), jnp.float32), axis=-1)

    # nn.MultiheadAttention-style init (xavier_uniform in_proj); small random biases to
    # exercise the fused-bias path (torch default bias is zeros).
    limit = math.sqrt(6.0 / (E + 3 * E))
    in_proj_w = jax.random.uniform(k3, (3 * E, E), jnp.float32, -limit, limit)
    in_proj_b = 0.01 * jax.random.normal(k6, (3 * E,), jnp.float32)
    wq, wk = in_proj_w[:E], in_proj_w[E:2 * E]       # V / out_proj are dead code for the output
    bq, bk = in_proj_b[:E], in_proj_b[E:2 * E]

    # Init-time fusion of Q/K projection params (scale folded; hoisted out of per-call path).
    w_fused, b_fused = prepare_qk_params(wq, wk, bq, bk)

    # Single-instance path (matches the module forward).
    out = distribution_denoise_attention(x, distribution, w_fused, b_fused)
    out = jax.block_until_ready(out)
    ref = _reference(x, distribution, wq, wk, bq, bk)
    assert out.shape == (N, L, E)
    assert jnp.allclose(out, ref, atol=1e-4, rtol=1e-4)

    # Batched grid path: amortize launch/DMA across independent instances.
    B = 4
    xB = jax.random.normal(k4, (B, L, N, E), jnp.float32)
    distB = jax.nn.softmax(jax.random.normal(k5, (B, N, L, L), jnp.float32), axis=-1)
    outB = jax.block_until_ready(
        distribution_denoise_attention_batched(xB, distB, w_fused, b_fused))
    refB = jax.vmap(lambda xx, dd: _reference(xx, dd, wq, wk, bq, bk))(xB, distB)
    assert outB.shape == (B, N, L, E)
    assert jnp.allclose(outB, refB, atol=1e-4, rtol=1e-4)

    print("KERNEL_OK")
</pallas_src>

<mosaic_0001>
module attributes {stable_mosaic.version = 11 : i64} {
  func.func @_dda_kernel(%arg0: i32, %arg1: memref<1x8x8x32xf32, #tpu.memory_space<vmem>>, %arg2: memref<1x8x8x8xf32, #tpu.memory_space<vmem>>, %arg3: memref<32x64xf32, #tpu.memory_space<vmem>>, %arg4: memref<1x64xf32, #tpu.memory_space<vmem>>, %arg5: memref<1x8x8x32xf32, #tpu.memory_space<vmem>>) attributes {dimension_semantics = [#tpu.dimension_semantics<parallel>], iteration_bounds = array<i64: 1>, scalar_prefetch = 0 : i64, scratch_operands = 0 : i64, tpu.core_type = #tpu.core_type<tc>, window_params = [{transform_indices = @transform_0, window_bounds = array<i64: 1, 8, 8, 32>}, {transform_indices = @transform_1, window_bounds = array<i64: 1, 8, 8, 8>}, {pipeline_mode = #tpu.pipeline_mode<synchronous>, transform_indices = @transform_2, window_bounds = array<i64: 32, 64>}, {pipeline_mode = #tpu.pipeline_mode<synchronous>, transform_indices = @transform_3, window_bounds = array<i64: 1, 64>}, {transform_indices = @transform_4, window_bounds = array<i64: 1, 8, 8, 32>}]} {
    %c0 = arith.constant 0 : index
    %c0_0 = arith.constant 0 : index
    %c0_1 = arith.constant 0 : index
    %c0_2 = arith.constant 0 : index
    %0 = vector.load %arg1[%c0, %c0_0, %c0_1, %c0_2] : memref<1x8x8x32xf32, #tpu.memory_space<vmem>>, vector<1x8x8x32xf32>
    %1 = vector.shape_cast %0 : vector<1x8x8x32xf32> to vector<8x8x32xf32>
    %2 = tpu.transpose %1, [1, 0, 2] : vector<8x8x32xf32> -> vector<8x8x32xf32>
    %3 = vector.shape_cast %2 : vector<8x8x32xf32> to vector<64x32xf32>
    %c0_3 = arith.constant 0 : index
    %c0_4 = arith.constant 0 : index
    %4 = vector.load %arg3[%c0_3, %c0_4] : memref<32x64xf32, #tpu.memory_space<vmem>>, vector<32x64xf32>
    %cst = arith.constant dense<0.000000e+00> : vector<64x64xf32>
    %5 = tpu.matmul %3, %4, %cst {dimension_numbers = #tpu.dot_dimension_numbers<[1], [0], [0], [1], [0, 0, 1, 1], [], []>} : vector<64x32xf32>, vector<32x64xf32>, vector<64x64xf32> -> vector<64x64xf32>
    %c0_5 = arith.constant 0 : index
    %c0_6 = arith.constant 0 : index
    %6 = vector.load %arg4[%c0_5, %c0_6] : memref<1x64xf32, #tpu.memory_space<vmem>>, vector<1x64xf32>
    %7 = vector.broadcast %6 : vector<1x64xf32> to vector<64x64xf32>
    %8 = arith.addf %5, %7 : vector<64x64xf32>
    %9 = vector.extract_strided_slice %8 {offsets = [0, 0], sizes = [64, 32], strides = [1, 1]} : vector<64x64xf32> to vector<64x32xf32>
    %10 = vector.shape_cast %9 : vector<64x32xf32> to vector<8x8x32xf32>
    %11 = vector.extract_strided_slice %8 {offsets = [0, 32], sizes = [64, 32], strides = [1, 1]} : vector<64x64xf32> to vector<64x32xf32>
    %12 = vector.shape_cast %11 : vector<64x32xf32> to vector<8x8x32xf32>
    %13 = vector.extract_strided_slice %10 {offsets = [0, 0, 0], sizes = [8, 8, 8], strides = [1, 1, 1]} : vector<8x8x32xf32> to vector<8x8x8xf32>
    %14 = vector.extract_strided_slice %10 {offsets = [0, 0, 8], sizes = [8, 8, 8], strides = [1, 1, 1]} : vector<8x8x32xf32> to vector<8x8x8xf32>
    %15 = vector.extract_strided_slice %10 {offsets = [0, 0, 16], sizes = [8, 8, 8], strides = [1, 1, 1]} : vector<8x8x32xf32> to vector<8x8x8xf32>
    %16 = vector.extract_strided_slice %10 {offsets = [0, 0, 24], sizes = [8, 8, 8], strides = [1, 1, 1]} : vector<8x8x32xf32> to vector<8x8x8xf32>
    %17 = tpu.concatenate %13, %14, %15, %16 in 0 : vector<8x8x8xf32>, vector<8x8x8xf32>, vector<8x8x8xf32>, vector<8x8x8xf32> -> vector<32x8x8xf32>
    %18 = vector.extract_strided_slice %12 {offsets = [0, 0, 0], sizes = [8, 8, 8], strides = [1, 1, 1]} : vector<8x8x32xf32> to vector<8x8x8xf32>
    %19 = vector.extract_strided_slice %12 {offsets = [0, 0, 8], sizes = [8, 8, 8], strides = [1, 1, 1]} : vector<8x8x32xf32> to vector<8x8x8xf32>
    %20 = vector.extract_strided_slice %12 {offsets = [0, 0, 16], sizes = [8, 8, 8], strides = [1, 1, 1]} : vector<8x8x32xf32> to vector<8x8x8xf32>
    %21 = vector.extract_strided_slice %12 {offsets = [0, 0, 24], sizes = [8, 8, 8], strides = [1, 1, 1]} : vector<8x8x32xf32> to vector<8x8x8xf32>
    %22 = tpu.concatenate %18, %19, %20, %21 in 0 : vector<8x8x8xf32>, vector<8x8x8xf32>, vector<8x8x8xf32>, vector<8x8x8xf32> -> vector<32x8x8xf32>
    "tpu.trace_start"() <{level = 10 : i32, message = "bid,bjd->bij"}> : () -> ()
    %cst_7 = arith.constant dense<0.000000e+00> : vector<32x8x8xf32>
    %23 = tpu.matmul %17, %22, %cst_7 {dimension_numbers = #tpu.dot_dimension_numbers<[2], [2], [1], [1], [0, 0, 0, 1, 1, 1], [0], [0]>} : vector<32x8x8xf32>, vector<32x8x8xf32>, vector<32x8x8xf32> -> vector<32x8x8xf32>
    "tpu.trace_stop"() : () -> ()
    %cst_8 = arith.constant dense<0xFF800000> : vector<32x8xf32>
    %24 = vector.multi_reduction <maximumf>, %23, %cst_8 [2] : vector<32x8x8xf32> to vector<32x8xf32>
    %25 = vector.shape_cast %24 : vector<32x8xf32> to vector<32x8x1xf32>
    %26 = vector.broadcast %25 : vector<32x8x1xf32> to vector<32x8x8xf32>
    %27 = arith.subf %23, %26 : vector<32x8x8xf32>
    %28 = math.exp %27 : vector<32x8x8xf32>
    %cst_9 = arith.constant dense<0.000000e+00> : vector<32x8xf32>
    %29 = vector.multi_reduction <add>, %28, %cst_9 [2] : vector<32x8x8xf32> to vector<32x8xf32>
    %30 = vector.shape_cast %29 : vector<32x8xf32> to vector<32x8x1xf32>
    %cst_10 = arith.constant 4.000000e+00 : f32
    %31 = vector.broadcast %cst_10 : f32 to vector<32x8x1xf32>
    %32 = arith.mulf %30, %31 : vector<32x8x1xf32>
    %33 = tpu.reciprocal %32 : vector<32x8x1xf32> -> vector<32x8x1xf32>
    %34 = vector.broadcast %33 : vector<32x8x1xf32> to vector<32x8x8xf32>
    %35 = arith.mulf %28, %34 : vector<32x8x8xf32>
    %36 = vector.shape_cast %35 : vector<32x8x8xf32> to vector<4x8x8x8xf32>
    %cst_11 = arith.constant dense<0.000000e+00> : vector<8x8x8xf32>
    %37 = vector.multi_reduction <add>, %36, %cst_11 [0] : vector<4x8x8x8xf32> to vector<8x8x8xf32>
    %c0_12 = arith.constant 0 : index
    %c0_13 = arith.constant 0 : index
    %c0_14 = arith.constant 0 : index
    %c0_15 = arith.constant 0 : index
    %38 = vector.load %arg2[%c0_12, %c0_13, %c0_14, %c0_15] : memref<1x8x8x8xf32, #tpu.memory_space<vmem>>, vector<1x8x8x8xf32>
    %39 = vector.shape_cast %38 : vector<1x8x8x8xf32> to vector<8x8x8xf32>
    %40 = arith.mulf %37, %39 : vector<8x8x8xf32>
    "tpu.trace_start"() <{level = 10 : i32, message = "nij,nje->nie"}> : () -> ()
    %cst_16 = arith.constant dense<0.000000e+00> : vector<8x8x32xf32>
    %41 = tpu.matmul %40, %1, %cst_16 {dimension_numbers = #tpu.dot_dimension_numbers<[2], [1], [1], [2], [0, 0, 0, 1, 1, 2], [0], [0]>} : vector<8x8x8xf32>, vector<8x8x32xf32>, vector<8x8x32xf32> -> vector<8x8x32xf32>
    "tpu.trace_stop"() : () -> ()
    %c0_17 = arith.constant 0 : index
    %c0_18 = arith.constant 0 : index
    %c0_19 = arith.constant 0 : index
    %c0_20 = arith.constant 0 : index
    %42 = vector.load %arg5[%c0_17, %c0_18, %c0_19, %c0_20] : memref<1x8x8x32xf32, #tpu.memory_space<vmem>>, vector<1x8x8x32xf32>
    %43 = vector.shape_cast %42 : vector<1x8x8x32xf32> to vector<8x8x32xf32>
    %44 = vector.shape_cast %41 : vector<8x8x32xf32> to vector<1x8x8x32xf32>
    tpu.vector_store %arg5[%c0_17, %c0_18, %c0_19, %c0_20], %44 {strides = array<i32>} : memref<1x8x8x32xf32, #tpu.memory_space<vmem>>, vector<1x8x8x32xf32>,
    return
  }
  func.func @transform_0(%arg0: i32) -> (i32, i32, i32, i32) {
    %c0_i32 = arith.constant 0 : i32
    %c0_i32_0 = arith.constant 0 : i32
    %c0_i32_1 = arith.constant 0 : i32
    %c0_i32_2 = arith.constant 0 : i32
    return %arg0, %c0_i32, %c0_i32_0, %c0_i32_1 : i32, i32, i32, i32
  }
  func.func @transform_1(%arg0: i32) -> (i32, i32, i32, i32) {
    %c0_i32 = arith.constant 0 : i32
    %c0_i32_0 = arith.constant 0 : i32
    %c0_i32_1 = arith.constant 0 : i32
    %c0_i32_2 = arith.constant 0 : i32
    return %arg0, %c0_i32, %c0_i32_0, %c0_i32_1 : i32, i32, i32, i32
  }
  func.func @transform_2(%arg0: i32) -> (i32, i32) {
    %c0_i32 = arith.constant 0 : i32
    %c0_i32_0 = arith.constant 0 : i32
    %c0_i32_1 = arith.constant 0 : i32
    return %c0_i32, %c0_i32_0 : i32, i32
  }
  func.func @transform_3(%arg0: i32) -> (i32, i32) {
    %c0_i32 = arith.constant 0 : i32
    %c0_i32_0 = arith.constant 0 : i32
    %c0_i32_1 = arith.constant 0 : i32
    return %c0_i32, %c0_i32_0 : i32, i32
  }
  func.func @transform_4(%arg0: i32) -> (i32, i32, i32, i32) {
    %c0_i32 = arith.constant 0 : i32
    %c0_i32_0 = arith.constant 0 : i32
    %c0_i32_1 = arith.constant 0 : i32
    %c0_i32_2 = arith.constant 0 : i32
    return %arg0, %c0_i32, %c0_i32_0, %c0_i32_1 : i32, i32, i32, i32
  }
}

</mosaic_0001>

<bundles_post_ra>
// kernel: tpu_custom_call.1
= control target key start
LH: loop header
LB: loop body
LE: loop exit
PB: predicated region body
PF: predicated region fallthrough
CT: control target
= control target key end

     0   :  { %9 = vsyncpa [#allocation3], 0  ;;  %s5430_s0 = inlined_call_operand.hbm [shape: f32[1,8,8,32], index: 0, kind: input, shape index: {}]   ;;  %s5431_s1 = inlined_call_operand.hbm [shape: f32[1,8,8,8], index: 1, kind: input, shape index: {}]   ;;  %s5432_s2 = inlined_call_operand.hbm [shape: f32[32,64], index: 2, kind: input, shape index: {}]   ;;  %s5433_s3 = inlined_call_operand.vmem [shape: f32[1,64], index: 3, kind: input, shape index: {}]   ;;  %s5434_s4 = inlined_call_operand.hbm [shape: f32[1,8,8,32], index: 4, kind: output, shape index: {}]  }
   0x1   :  { %10 = vsyncpa [#allocation6], 0 }
   0x2   :  { %11 = vsyncpa [#allocation4], 0  ;;  %s4550_s15 = smov [#allocation5]   ;;  %s4551_s17 = smov [#allocation2]  }
   0x3   :  { %s29_s16 = sshll.u32 %s4550_s15, 4  ;;  %s17_s18 = sshll.u32 %s4551_s17, 4  ;;  %s30_s16 = int_to_ptr.vmem [resolvable:$true] %s29_s16  ;;  %s4589_s18 = int_to_ptr.vmem [resolvable:$true] %s17_s18 }
   0x4   :  { %s4456_s21 = scalar_lea.hbm %s5431_s1, 1024 }
   0x5   :  { %p4457_p0 = scmp.ne.s32.totalorder %s5431_s1, %s4456_s21  ;;  %p4460_p1 = scmp.lt.u32.totalorder %s4456_s21, %s5431_s1 }
   0x7   :  { %p4462_p2 = pnand %p4460_p1, %p4457_p0 }
   0x9   :  { %4465 = shalt.err (!%p4462_p2)
}
   0xa   :  { %s4466_s26 = scalar_lea.vmem %s30_s16, 1024  ;;  %p4471_p4 = scmp.lt.s32.totalorder %s30_s16, %s30_s16 }
   0xb   :  { %p4467_p3 = scmp.ne.s32.totalorder %s30_s16, %s4466_s26  ;;  %p4472_p5 = scmp.lt.s32.totalorder %s4466_s26, %s4466_s26 }
   0xd   :  { %p4473_p6 = por %p4472_p5, %p4471_p4 }
   0xf   :  { %p4474_p7 = pnand %p4473_p6, %p4467_p3 }
  0x11   :  { %4477 = shalt.err (!%p4474_p7)
}
  0x12   :  { %s4552_s27 = smov 128   ;;  %s4553_s28 = smov 8  }
  0x13   :  { %35 = dma.hbm_to_vmem [thread:$0]  %s5431_s1, 1024, %s30_s16, [#allocation6], %s4552_s27, %s4552_s27, %s4553_s28  }
  0x14   :  { %s4478_s7 = scalar_lea.hbm %s5430_s0, 1024 }
  0x15   :  { %p4479_p8 = scmp.ne.s32.totalorder %s5430_s0, %s4478_s7  ;;  %p4482_p9 = scmp.lt.u32.totalorder %s4478_s7, %s5430_s0 }
  0x17   :  { %p4484_p10 = pnand %p4482_p9, %p4479_p8 }
  0x19   :  { %4487 = shalt.err (!%p4484_p10)
}
  0x1a   :  { %s4488_s12 = scalar_lea.vmem %s4589_s18, 1024  ;;  %p4493_p12 = scmp.lt.s32.totalorder %s4589_s18, %s4589_s18 }
  0x1b   :  { %p4489_p11 = scmp.ne.s32.totalorder %s4589_s18, %s4488_s12  ;;  %p4494_p13 = scmp.lt.s32.totalorder %s4488_s12, %s4488_s12 }
  0x1d   :  { %p4495_p0 = por %p4494_p13, %p4493_p12 }
  0x1f   :  { %p4496_p1 = pnand %p4495_p0, %p4489_p11 }
  0x21   :  { %4499 = shalt.err (!%p4496_p1)
}
  0x22   :  { %23 = dma.hbm_to_vmem [thread:$0]  %s5430_s0, 1024, %s4589_s18, [#allocation3], %s4552_s27, %s4552_s27, %s4553_s28  }
  0x23   :  { %s4554_s14 = smov [#allocation7]   ;;  %s4500_s19 = scalar_lea.hbm %s5432_s2, 512 }
  0x24   :  { %s41_s15 = sshll.u32 %s4554_s14, 4  ;;  %p4501_p2 = scmp.ne.s32.totalorder %s5432_s2, %s4500_s19  ;;  %s42_s15 = int_to_ptr.vmem [resolvable:$true] %s41_s15 }
  0x25   :  { %p4504_p3 = scmp.lt.u32.totalorder %s4500_s19, %s5432_s2 }
  0x27   :  { %p4506_p4 = pnand %p4504_p3, %p4501_p2 }
  0x29   :  { %4509 = shalt.err (!%p4506_p4)
}
  0x2a   :  { %s4510_s24 = scalar_lea.vmem %s42_s15, 512  ;;  %p4515_p6 = scmp.lt.s32.totalorder %s42_s15, %s42_s15 }
  0x2b   :  { %p4511_p5 = scmp.ne.s32.totalorder %s42_s15, %s4510_s24  ;;  %p4516_p7 = scmp.lt.s32.totalorder %s4510_s24, %s4510_s24 }
  0x2d   :  { %p4517_p8 = por %p4516_p7, %p4515_p6 }
  0x2f   :  { %p4518_p9 = pnand %p4517_p8, %p4511_p5 }
  0x31   :  { %4521 = shalt.err (!%p4518_p9)
}
  0x32   :  { %47 = dma.hbm_to_vmem [thread:$0]  %s5432_s2, 512, %s42_s15, [#allocation6], %s4552_s27, %s4552_s27, %s4553_s28  }
  0x33   :  { %4544 = dma.done.wait [#allocation3], 1024  }
  0x34   :  { %4545 = vsyncadd [#allocation3], 4294966272 }
  0x35   :  { %4546 = dma.done.wait [#allocation6], 1536  }
  0x36   :  { %4547 = vsyncadd [#allocation6], 4294965760  ;;  %v72_v0 = vlaneseq  ;;  %v4555_v1 = vmov 1983009808   ;;  %v4556_v3 = vmov 1934713408  }
  0x37   :  { %v70_v2 = vunpack.c.l.s4 %v4555_v1  ;;  %v134_v4 = vunpack.c.l.s4 %v4556_v3  ;;  %v203_v8 = vld [vmem:[#allocation7] sm:$0xff]  ;;  %v204_v9 = vld [vmem:[#allocation7 + $0x8] sm:$0xff]  ;;  %v205_v10 = vld [vmem:[#allocation7 + $0x10] sm:$0xff]  ;;  %vm214_vm0 = vcmask 261120   ;;  %s4557_s26 = smov 112   ;;  %s4558_s29 = smov 120  }
  0x38   :  { %v73_v6 = vshrl.u32 %v72_v0, 7  ;;  %v4292_v11 = vpack.c.bf16 %v204_v9, %v203_v8  ;;  %v206_v12 = vld [vmem:[#allocation7 + $0x18] sm:$0xff]  ;;  %v4641_v13 = vld [vmem:[#allocation2] sm:$0xff]  ;;  %v4643_v14 = vld [vmem:[#allocation2 + $0x8] sm:$0xff]  ;;  %vm4560_vm1 = vmmov 0   ;;  %s4562_s30 = smov 96  }
  0x39   :  { %v71_v5 = vunpack.c.0.s8 %v70_v2  ;;  %v135_v7 = vunpack.c.0.s8 %v134_v4  ;;  %v4296_v16 = vpack.c.bf16 %v206_v12, %v205_v10  ;;  %v61_v17 = vld [vmem:[#allocation2 + $0x10] sm:$0xff]  ;;  %v62_v18 = vld [vmem:[#allocation2 + $0x18] sm:$0xff]  ;;  %v63_v19 = vld [vmem:[#allocation2 + $0x20] sm:$0xff]  ;;  %vm402_vm2 = vcmask 64512   ;;  %s4563_s5 = smov [#allocation8]  }
  0x3a   :  { %4293 = vmatprep.subr.bf16.mxu0 %v4292_v11  ;;  %v64_v21 = vld [vmem:[#allocation2 + $0x28] sm:$0xff]  ;;  %v65_v22 = vld [vmem:[#allocation2 + $0x30] sm:$0xff]  ;;  %v66_v23 = vld [vmem:[#allocation2 + $0x38] sm:$0xff]  ;;  %v67_v24 = vcombine.low %v4641_v13, %v61_v17  ;;  %v68_v25 = vcombine.high %v4641_v13, %v61_v17  ;;  %v83_v26 = vcombine.low %v4643_v14, %v62_v18  ;;  %v84_v27 = vcombine.high %v4643_v14, %v62_v18  ;;  %s3886_s6 = sshll.u32 %s4563_s5, 4  ;;  %s3887_s6 = int_to_ptr.vmem [resolvable:$true] %s3886_s6 }
  0x3b   :  { %v74_v15 = vsub.s32 %v71_v5, %v73_v6  ;;  %v138_v20 = vsub.s32 %v135_v7, %v73_v6  ;;  %4295 = vmatpush3.bf16.msra.mxu0 %v4292_v11  ;;  %v99_v28 = vcombine.low %v63_v19, %v65_v22  ;;  %v100_v29 = vcombine.high %v63_v19, %v65_v22  ;;  %v3899_v0 = vld [vmem:[%s5433_s3] ss:$0 sm:$0xff]  ;;  %s4561_s3 = smov 104   ;;  %s4522_s7 = scalar_lea.vmem %s3887_s6, 1024 }
  0x3c   :  { %v115_v30 = vcombine.low %v64_v21, %v66_v23  ;;  %v116_v31 = vcombine.high %v64_v21, %v66_v23  ;;  %4297 = vmatprep.subr.bf16.mxu0 %v4296_v16  ;;  %v4559_v19 = vmov 0.0   ;;  %p4523_p10 = scmp.ne.s32.totalorder %s3887_s6, %s4522_s7  ;;  %p4527_p11 = scmp.lt.s32.totalorder %s3887_s6, %s3887_s6 }
  0x3d   :  { %v75_v32 = vrot.slane %v67_v24, %v74_v15  ;;  %v91_v33 = vrot.slane %v83_v26, %v74_v15  ;;  %v82_v34 = vrot.slane %v68_v25, %v74_v15  ;;  %v98_v35 = vrot.slane %v84_v27, %v74_v15  ;;  %4092 = vmatprep.subr.mxu1 %v4559_v19  ;;  %p4528_p12 = scmp.lt.s32.totalorder %s4522_s7, %s4522_s7 }
  0x3e   :  { %v107_v36 = vrot.slane %v99_v28, %v74_v15  ;;  %v123_v37 = vrot.slane %v115_v30, %v74_v15  ;;  %v114_v38 = vrot.slane %v100_v29, %v74_v15  ;;  %v130_v39 = vrot.slane %v116_v31, %v74_v15  ;;  %4094 = vmatprep.mubr.msk.f32.mxu1 %vm4560_vm1, %v4559_v19 }
  0x3f   :  { %v131_v40 = vcombine.low %v75_v32, %v91_v33  ;;  %v132_v41 = vcombine.high %v75_v32, %v91_v33  ;;  %v147_v42 = vcombine.low %v82_v34, %v98_v35  ;;  %4299 = vmatpush3.bf16.msra.mxu0 %v4296_v16  ;;  %v148_v51 = vcombine.high %v82_v34, %v98_v35  ;;  %p4529_p13 = por %p4528_p12, %p4527_p11 }
  0x40   :  { %v163_v43 = vcombine.low %v107_v36, %v123_v37  ;;  %v164_v44 = vcombine.high %v107_v36, %v123_v37  ;;  %v179_v45 = vcombine.low %v114_v38, %v130_v39  ;;  %v180_v52 = vcombine.high %v114_v38, %v130_v39  ;;  %4117 = vmatprep.subr.mxu0 %v4559_v19 }
  0x41   :  { %v139_v46 = vrot.slane %v131_v40, %v138_v20  ;;  %v146_v47 = vrot.slane %v132_v41, %v138_v20  ;;  %v155_v50 = vrot.slane %v147_v42, %v138_v20  ;;  %v162_v59 = vrot.slane %v148_v51, %v138_v20  ;;  %p4530_p0 = pnand %p4529_p13, %p4523_p10 }
  0x42   :  { %v171_v48 = vrot.slane %v163_v43, %v138_v20  ;;  %v178_v49 = vrot.slane %v164_v44, %v138_v20  ;;  %v187_v56 = vrot.slane %v179_v45, %v138_v20  ;;  %v194_v60 = vrot.slane %v180_v52, %v138_v20 }
  0x44   :  { %v195_v53 = vcombine.low %v139_v46, %v171_v48  ;;  %v196_v54 = vcombine.high %v139_v46, %v171_v48  ;;  %v197_v55 = vcombine.low %v146_v47, %v178_v49  ;;  %v198_v57 = vcombine.high %v146_v47, %v178_v49 }
  0x45   :  { %v199_v58 = vcombine.low %v155_v50, %v187_v56  ;;  %v200_v61 = vcombine.high %v155_v50, %v187_v56  ;;  %v201_v62 = vcombine.low %v162_v59, %v194_v60  ;;  %v202_v63 = vcombine.high %v162_v59, %v194_v60 }
  0x46   :  { %4080 = vmatprep.mubr.msk.f32.mxu0 %vm214_vm0, %v195_v53 }
  0x47   :  { %4081 = vmatmul.mubr.msk.f32.vlgmr.msra.gmra.mrb[0].mxu0 %vm214_vm0, %v196_v54 }
  0x48   :  { %4083 = vmatprep.mubr.msk.f32.mxu0 %vm214_vm0, %v197_v55 }
  0x4b   :  { %4084 = vmatmul.mubr.msk.f32.gmra.mrb[2].mxu0 %vm214_vm0, %v198_v57 }
  0x4c   :  { %4086 = vmatprep.mubr.msk.f32.mxu0 %vm214_vm0, %v199_v58 }
  0x4f   :  { %4087 = vmatmul.mubr.msk.f32.gmra.mrb[4].mxu0 %vm214_vm0, %v200_v61 }
  0x50   :  { %4089 = vmatprep.mubr.msk.f32.mxu0 %vm214_vm0, %v201_v62 }
  0x53   :  { %4090 = vmatmul.mubr.msk.f32.gmra.mrb[6].mxu0 %vm214_vm0, %v202_v63 }
  0x54   :  { %4119 = vmatprep.mubr.msk.f32.mxu0 %vm4560_vm1, %v4559_v19 }
 0x11a   :  { %v4082_v1 = vpop.f32.mrb[0].mxu0 }
 0x11b   :  { %v4660_v2 = vadd.f32 %v4082_v1, %v3899_v0  ;;  %v305_v3 = vpop.f32.mrb[1].mxu0 }
 0x11c   :  { %v4665_v5 = vadd.f32 %v3899_v0, %v305_v3 }
 0x11d   :  { %370 = vrot.lane.b32.xlu1 %v4660_v2, %s4557_s26  ;;  %354 = vrot.lane.b32.xlu0 %v4660_v2, %s4558_s29 }
 0x11e   :  { %v4085_v4 = vpop.f32.mrb[2].mxu0 }
 0x11f   :  { %v4667_v6 = vadd.f32 %v4085_v4, %v3899_v0  ;;  %v315_v7 = vpop.f32.mrb[3].mxu0 }
 0x120   :  { %v4671_v8 = vadd.f32 %v3899_v0, %v315_v7 }
 0x121   :  { %358 = vrot.lane.b32.xlu1 %v4667_v6, %s4558_s29  ;;  %352 = vrot.lane.b32.xlu0 %v4665_v5, %s4558_s29 }
 0x122   :  { %v4088_v9 = vpop.f32.mrb[4].mxu0 }
 0x123   :  { %v325_v10 = vpop.f32.mrb[5].mxu0  ;;  %v4676_v11 = vadd.f32 %v4088_v9, %v3899_v0 }
 0x124   :  { %v4678_v16 = vadd.f32 %v3899_v0, %v325_v10 }
 0x125   :  { %356 = vrot.lane.b32.xlu1 %v4671_v8, %s4558_s29  ;;  %368 = vrot.lane.b32.xlu0 %v4665_v5, %s4557_s26 }
 0x126   :  { %v4091_v12 = vpop.f32.mrb[6].mxu0 }
 0x127   :  { %v335_v15 = vpop.f32.mrb[7].mxu0  ;;  %v4683_v17 = vadd.f32 %v4091_v12, %v3899_v0 }
 0x128   :  { %v4685_v18 = vadd.f32 %v3899_v0, %v335_v15 }
 0x129   :  { %362 = vrot.lane.b32.xlu1 %v4676_v11, %s4558_s29  ;;  %372 = vrot.lane.b32.xlu0 %v4671_v8, %s4557_s26 }
 0x12d   :  { %366 = vrot.lane.b32.xlu1 %v4683_v17, %s4558_s29  ;;  %360 = vrot.lane.b32.xlu0 %v4678_v16, %s4558_s29 }
 0x131   :  { %374 = vrot.lane.b32.xlu1 %v4667_v6, %s4557_s26  ;;  %364 = vrot.lane.b32.xlu0 %v4685_v18, %s4558_s29 }
 0x135   :  { %378 = vrot.lane.b32.xlu1 %v4676_v11, %s4557_s26  ;;  %376 = vrot.lane.b32.xlu0 %v4678_v16, %s4557_s26 }
 0x139   :  { %382 = vrot.lane.b32.xlu1 %v4683_v17, %s4557_s26  ;;  %384 = vrot.lane.b32.xlu0 %v4665_v5, %s4561_s3 }
 0x13d   :  { %386 = vrot.lane.b32.xlu1 %v4660_v2, %s4561_s3  ;;  %400 = vrot.lane.b32.xlu0 %v4665_v5, %s4562_s30 }
 0x141   :  { %388 = vrot.lane.b32.xlu1 %v4671_v8, %s4561_s3  ;;  %380 = vrot.lane.b32.xlu0 %v4685_v18, %s4557_s26 }
 0x145   :  { %477 = vrot.lane.b32.xlu1 %v4660_v2, %s4562_s30  ;;  %390 = vrot.lane.b32.xlu0 %v4667_v6, %s4561_s3 }
 0x149   :  { %394 = vrot.lane.b32.xlu1 %v4676_v11, %s4561_s3  ;;  %392 = vrot.lane.b32.xlu0 %v4678_v16, %s4561_s3 }
 0x14d   :  { %396 = vrot.lane.b32.xlu1 %v4685_v18, %s4561_s3  ;;  %553 = vrot.lane.b32.xlu0 %v4671_v8, %s4562_s30 }
 0x151   :  { %629 = vrot.lane.b32.xlu1 %v4667_v6, %s4562_s30  ;;  %398 = vrot.lane.b32.xlu0 %v4683_v17, %s4561_s3 }
 0x155   :  { %781 = vrot.lane.b32.xlu1 %v4676_v11, %s4562_s30  ;;  %705 = vrot.lane.b32.xlu0 %v4678_v16, %s4562_s30 }
 0x159   :  { %933 = vrot.lane.b32.xlu1 %v4683_v17, %s4562_s30  ;;  %857 = vrot.lane.b32.xlu0 %v4685_v18, %s4562_s30 }
 0x18f   :  { %v4730_v20 = vpop.permute.xlu1 %370  ;;  %v4732_v21 = vpop.permute.xlu0 %354 }
 0x190   :  { %1085 = vrot.lane.b32.xlu1 %v4732_v21, %s4562_s30 }
 0x193   :  { %v4736_v22 = vpop.permute.xlu1 %358  ;;  %v4738_v23 = vpop.permute.xlu0 %352 }
 0x194   :  { %1237 = vrot.lane.b32.xlu1 %v4736_v22, %s4562_s30  ;;  %1009 = vrot.lane.b32.xlu0 %v4738_v23, %s4562_s30 }
 0x197   :  { %v4744_v24 = vpop.permute.xlu1 %356  ;;  %v4746_v25 = vpop.permute.xlu0 %368 }
 0x198   :  { %1161 = vrot.lane.b32.xlu0 %v4744_v24, %s4562_s30 }
 0x19b   :  { %v4750_v26 = vpop.permute.xlu1 %362  ;;  %v4752_v27 = vpop.permute.xlu0 %372 }
 0x19c   :  { %1389 = vrot.lane.b32.xlu1 %v4750_v26, %s4562_s30 }
 0x19f   :  { %v4756_v28 = vpop.permute.xlu1 %366  ;;  %v4758_v29 = vpop.permute.xlu0 %360 }
 0x1a0   :  { %1541 = vrot.lane.b32.xlu1 %v4756_v28, %s4562_s30  ;;  %1313 = vrot.lane.b32.xlu0 %v4758_v29, %s4562_s30 }
 0x1a3   :  { %v4764_v30 = vpop.permute.xlu1 %374  ;;  %v4766_v31 = vpop.permute.xlu0 %364 }
 0x1a4   :  { %1693 = vrot.lane.b32.xlu1 %v4730_v20, %s4562_s30  ;;  %1465 = vrot.lane.b32.xlu0 %v4766_v31, %s4562_s30 }
 0x1a7   :  { %v4772_v32 = vpop.permute.xlu1 %378  ;;  %v4774_v33 = vpop.permute.xlu0 %376 }
 0x1a8   :  { %1845 = vrot.lane.b32.xlu1 %v4764_v30, %s4562_s30  ;;  %1617 = vrot.lane.b32.xlu0 %v4746_v25, %s4562_s30 }
 0x1ab   :  { %v4780_v34 = vpop.permute.xlu1 %382  ;;  %v4782_v35 = vpop.permute.xlu0 %384 }
 0x1ac   :  { %1997 = vrot.lane.b32.xlu1 %v4772_v32, %s4562_s30  ;;  %1769 = vrot.lane.b32.xlu0 %v4752_v27, %s4562_s30 }
 0x1af   :  { %v4788_v36 = vpop.permute.xlu1 %386  ;;  %v401_v37 = vpop.permute.xlu0 %400 }
 0x1b0   :  { %2149 = vrot.lane.b32.xlu1 %v4780_v34, %s4562_s30  ;;  %1921 = vrot.lane.b32.xlu0 %v4774_v33, %s4562_s30 }
 0x1b1   :  { %4093 = vmatpush3.xpose.msk.msra.mxu1 %vm402_vm2, %v401_v37 }
 0x1b2   :  { %4097 = vmatprep.subr.mxu1 %v4559_v19 }
 0x1b3   :  { %v4796_v38 = vpop.permute.xlu1 %388  ;;  %v4798_v39 = vpop.permute.xlu0 %380 }
 0x1b4   :  { %4095 = vmatmul.mubr.msk.f32.vlgmr.msra.gmra.mrb[0].mxu1 %vm402_vm2, %v4665_v5  ;;  %2301 = vrot.lane.b32.xlu1 %v4788_v36, %s4562_s30 }
 0x1b5   :  { %2073 = vrot.lane.b32.xlu0 %v4798_v39, %s4562_s30  ;;  %4099 = vmatprep.mubr.msk.f32.mxu1 %vm4560_vm1, %v4559_v19 }
 0x1b7   :  { %v478_v40 = vpop.permute.xlu1 %477  ;;  %v4808_v41 = vpop.permute.xlu0 %390 }
 0x1b8   :  { %4098 = vmatpush3.xpose.msk.msra.mxu1 %vm402_vm2, %v478_v40  ;;  %2453 = vrot.lane.b32.xlu1 %v4808_v41, %s4562_s30 }
 0x1b9   :  { %2225 = vrot.lane.b32.xlu0 %v4782_v35, %s4562_s30  ;;  %4102 = vmatprep.subr.mxu1 %v4559_v19 }
 0x1bb   :  { %v4816_v42 = vpop.permute.xlu1 %394  ;;  %4100 = vmatmul.mubr.msk.f32.vlgmr.msra.gmra.mrb[2].mxu1 %vm402_vm2, %v4660_v2  ;;  %v4820_v43 = vpop.permute.xlu0 %392 }
 0x1bc   :  { %2605 = vrot.lane.b32.xlu1 %v4816_v42, %s4562_s30  ;;  %4104 = vmatprep.mubr.msk.f32.mxu1 %vm4560_vm1, %v4559_v19 }
 0x1bd   :  { %2377 = vrot.lane.b32.xlu0 %v4796_v38, %s4562_s30 }
 0x1bf   :  { %v4828_v44 = vpop.permute.xlu1 %396  ;;  %v554_v45 = vpop.permute.xlu0 %553 }
 0x1c0   :  { %4103 = vmatpush3.xpose.msk.msra.mxu1 %vm402_vm2, %v554_v45 }
 0x1c1   :  { %2529 = vrot.lane.b32.xlu0 %v4820_v43, %s4562_s30  ;;  %4107 = vmatprep.subr.mxu1 %v4559_v19 }
 0x1c3   :  { %v630_v46 = vpop.permute.xlu1 %629  ;;  %4105 = vmatmul.mubr.msk.f32.vlgmr.msra.gmra.mrb[4].mxu1 %vm402_vm2, %v4671_v8  ;;  %v4836_v47 = vpop.permute.xlu0 %398 }
 0x1c4   :  { %4108 = vmatpush3.xpose.msk.msra.mxu1 %vm402_vm2, %v630_v46  ;;  %2757 = vrot.lane.b32.xlu1 %v4836_v47, %s4562_s30 }
 0x1c5   :  { %2681 = vrot.lane.b32.xlu0 %v4828_v44, %s4562_s30  ;;  %4109 = vmatprep.mubr.msk.f32.mxu1 %vm4560_vm1, %v4559_v19 }
 0x1c6   :  { %4112 = vmatprep.subr.mxu1 %v4559_v19 }
 0x1c7   :  { %v782_v48 = vpop.permute.xlu1 %781  ;;  %4110 = vmatmul.mubr.msk.f32.vlgmr.msra.gmra.mrb[6].mxu1 %vm402_vm2, %v4667_v6  ;;  %v706_v49 = vpop.permute.xlu0 %705 }
 0x1c8   :  { %4113 = vmatpush3.xpose.msk.msra.mxu1 %vm402_vm2, %v706_v49  ;;  %4118 = vmatpush3.xpose.msk.msra.mxu0 %vm402_vm2, %v782_v48 }
 0x1c9   :  { %4114 = vmatprep.mubr.msk.f32.mxu1 %vm4560_vm1, %v4559_v19  ;;  %4127 = vmatprep.subr.mxu0 %v4559_v19 }
 0x1ca   :  { %4122 = vmatprep.subr.mxu1 %v4559_v19 }
 0x1cb   :  { %4120 = vmatmul.mubr.msk.f32.vlgmr.msra.gmra.mrb[8].mxu0 %vm402_vm2, %v4676_v11  ;;  %v934_v50 = vpop.permute.xlu1 %933  ;;  %4115 = vmatmul.mubr.msk.f32.vlgmr.msra.gmra.mrb[8].mxu1 %vm402_vm2, %v4678_v16  ;;  %v858_v51 = vpop.permute.xlu0 %857 }
 0x1cc   :  { %4123 = vmatpush3.xpose.msk.msra.mxu1 %vm402_vm2, %v858_v51  ;;  %4128 = vmatpush3.xpose.msk.msra.mxu0 %vm402_vm2, %v934_v50 }
 0x1cd   :  { %4124 = vmatprep.mubr.msk.f32.mxu1 %vm4560_vm1, %v4559_v19  ;;  %4129 = vmatprep.mubr.msk.f32.mxu0 %vm4560_vm1, %v4559_v19 }
 0x1ce   :  { %4137 = vmatprep.subr.mxu0 %v4559_v19  ;;  %4132 = vmatprep.subr.mxu1 %v4559_v19 }
 0x1cf   :  { %4125 = vmatmul.mubr.msk.f32.vlgmr.msra.gmra.mrb[10].mxu1 %vm402_vm2, %v4685_v18  ;;  %4130 = vmatmul.mubr.msk.f32.vlgmr.msra.gmra.mrb[10].mxu0 %vm402_vm2, %v4683_v17 }
 0x1d0   :  { %4139 = vmatprep.mubr.msk.f32.mxu0 %vm4560_vm1, %v4559_v19  ;;  %4134 = vmatprep.mubr.msk.f32.mxu1 %vm4560_vm1, %v4559_v19 }
 0x202   :  { %v1086_v52 = vpop.permute.xlu1 %1085 }
 0x203   :  { %4138 = vmatpush3.xpose.msk.msra.mxu0 %vm402_vm2, %v1086_v52 }
 0x204   :  { %4147 = vmatprep.subr.mxu0 %v4559_v19 }
 0x206   :  { %4140 = vmatmul.mubr.msk.f32.vlgmr.msra.gmra.mrb[12].mxu0 %vm402_vm2, %v4732_v21  ;;  %v1238_v53 = vpop.permute.xlu1 %1237  ;;  %v1010_v54 = vpop.permute.xlu0 %1009 }
 0x207   :  { %4133 = vmatpush3.xpose.msk.msra.mxu1 %vm402_vm2, %v1010_v54  ;;  %4148 = vmatpush3.xpose.msk.msra.mxu0 %vm402_vm2, %v1238_v53 }
 0x208   :  { %4149 = vmatprep.mubr.msk.f32.mxu0 %vm4560_vm1, %v4559_v19  ;;  %4142 = vmatprep.subr.mxu1 %v4559_v19 }
 0x209   :  { %4157 = vmatprep.subr.mxu0 %v4559_v19 }
 0x20a   :  { %4135 = vmatmul.mubr.msk.f32.vlgmr.msra.gmra.mrb[12].mxu1 %vm402_vm2, %v4738_v23  ;;  %4150 = vmatmul.mubr.msk.f32.vlgmr.msra.gmra.mrb[14].mxu0 %vm402_vm2, %v4736_v22  ;;  %v1162_v55 = vpop.permute.xlu0 %1161 }
 0x20b   :  { %4143 = vmatpush3.xpose.msk.msra.mxu1 %vm402_vm2, %v1162_v55  ;;  %4144 = vmatprep.mubr.msk.f32.mxu1 %vm4560_vm1, %v4559_v19 }
 0x20c   :  { %4159 = vmatprep.mubr.msk.f32.mxu0 %vm4560_vm1, %v4559_v19  ;;  %4152 = vmatprep.subr.mxu1 %v4559_v19 }
 0x20e   :  { %v1390_v56 = vpop.permute.xlu1 %1389  ;;  %4145 = vmatmul.mubr.msk.f32.vlgmr.msra.gmra.mrb[14].mxu1 %vm402_vm2, %v4744_v24 }
 0x20f   :  { %4158 = vmatpush3.xpose.msk.msra.mxu0 %vm402_vm2, %v1390_v56  ;;  %4154 = vmatprep.mubr.msk.f32.mxu1 %vm4560_vm1, %v4559_v19 }
 0x210   :  { %4167 = vmatprep.subr.mxu0 %v4559_v19 }
 0x212   :  { %4160 = vmatmul.mubr.msk.f32.vlgmr.msra.gmra.mrb[16].mxu0 %vm402_vm2, %v4750_v26  ;;  %v1542_v57 = vpop.permute.xlu1 %1541  ;;  %v1314_v58 = vpop.permute.xlu0 %1313 }
 0x213   :  { %4153 = vmatpush3.xpose.msk.msra.mxu1 %vm402_vm2, %v1314_v58  ;;  %4168 = vmatpush3.xpose.msk.msra.mxu0 %vm402_vm2, %v1542_v57 }
 0x214   :  { %4169 = vmatprep.mubr.msk.f32.mxu0 %vm4560_vm1, %v4559_v19  ;;  %4177 = vmatprep.subr.mxu0 %v4559_v19 }
 0x215   :  { %4162 = vmatprep.subr.mxu1 %v4559_v19 }
 0x216   :  { %4170 = vmatmul.mubr.msk.f32.vlgmr.msra.gmra.mrb[18].mxu0 %vm402_vm2, %v4756_v28  ;;  %v1694_v59 = vpop.permute.xlu1 %1693  ;;  %4155 = vmatmul.mubr.msk.f32.vlgmr.msra.gmra.mrb[16].mxu1 %vm402_vm2, %v4758_v29  ;;  %v1466_v60 = vpop.permute.xlu0 %1465 }
 0x217   :  { %4163 = vmatpush3.xpose.msk.msra.mxu1 %vm402_vm2, %v1466_v60  ;;  %4178 = vmatpush3.xpose.msk.msra.mxu0 %vm402_vm2, %v1694_v59 }
 0x218   :  { %4164 = vmatprep.mubr.msk.f32.mxu1 %vm4560_vm1, %v4559_v19  ;;  %4179 = vmatprep.mubr.msk.f32.mxu0 %vm4560_vm1, %v4559_v19 }
 0x219   :  { %4187 = vmatprep.subr.mxu0 %v4559_v19  ;;  %4172 = vmatprep.subr.mxu1 %v4559_v19 }
 0x21a   :  { %4180 = vmatmul.mubr.msk.f32.vlgmr.msra.gmra.mrb[20].mxu0 %vm402_vm2, %v4730_v20  ;;  %v1846_v61 = vpop.permute.xlu1 %1845  ;;  %4165 = vmatmul.mubr.msk.f32.vlgmr.msra.gmra.mrb[18].mxu1 %vm402_vm2, %v4766_v31  ;;  %v1618_v62 = vpop.permute.xlu0 %1617 }
 0x21b   :  { %4173 = vmatpush3.xpose.msk.msra.mxu1 %vm402_vm2, %v1618_v62  ;;  %4188 = vmatpush3.xpose.msk.msra.mxu0 %vm402_vm2, %v1846_v61 }
 0x21c   :  { %4174 = vmatprep.mubr.msk.f32.mxu1 %vm4560_vm1, %v4559_v19  ;;  %4189 = vmatprep.mubr.msk.f32.mxu0 %vm4560_vm1, %v4559_v19 }
 0x21d   :  { %4197 = vmatprep.subr.mxu0 %v4559_v19  ;;  %4182 = vmatprep.subr.mxu1 %v4559_v19 }
 0x21e   :  { %4190 = vmatmul.mubr.msk.f32.vlgmr.msra.gmra.mrb[22].mxu0 %vm402_vm2, %v4764_v30  ;;  %v1998_v63 = vpop.permute.xlu1 %1997  ;;  %4175 = vmatmul.mubr.msk.f32.vlgmr.msra.gmra.mrb[20].mxu1 %vm402_vm2, %v4746_v25  ;;  %v1770_v0 = vpop.permute.xlu0 %1769 }
 0x21f   :  { %4183 = vmatpush3.xpose.msk.msra.mxu1 %vm402_vm2, %v1770_v0  ;;  %4198 = vmatpush3.xpose.msk.msra.mxu0 %vm402_vm2, %v1998_v63 }
 0x220   :  { %4184 = vmatprep.mubr.msk.f32.mxu1 %vm4560_vm1, %v4559_v19  ;;  %4199 = vmatprep.mubr.msk.f32.mxu0 %vm4560_vm1, %v4559_v19 }
 0x221   :  { %4207 = vmatprep.subr.mxu0 %v4559_v19  ;;  %4192 = vmatprep.subr.mxu1 %v4559_v19 }
 0x222   :  { %4200 = vmatmul.mubr.msk.f32.vlgmr.msra.gmra.mrb[24].mxu0 %vm402_vm2, %v4772_v32  ;;  %v2150_v1 = vpop.permute.xlu1 %2149  ;;  %4185 = vmatmul.mubr.msk.f32.vlgmr.msra.gmra.mrb[22].mxu1 %vm402_vm2, %v4752_v27  ;;  %v1922_v2 = vpop.permute.xlu0 %1921 }
 0x223   :  { %4193 = vmatpush3.xpose.msk.msra.mxu1 %vm402_vm2, %v1922_v2  ;;  %4208 = vmatpush3.xpose.msk.msra.mxu0 %vm402_vm2, %v2150_v1 }
 0x224   :  { %4194 = vmatprep.mubr.msk.f32.mxu1 %vm4560_vm1, %v4559_v19  ;;  %4209 = vmatprep.mubr.msk.f32.mxu0 %vm4560_vm1, %v4559_v19 }
 0x225   :  { %4217 = vmatprep.subr.mxu0 %v4559_v19  ;;  %4202 = vmatprep.subr.mxu1 %v4559_v19 }
 0x226   :  { %4210 = vmatmul.mubr.msk.f32.vlgmr.msra.gmra.mrb[26].mxu0 %vm402_vm2, %v4780_v34  ;;  %v2302_v3 = vpop.permute.xlu1 %2301  ;;  %4195 = vmatmul.mubr.msk.f32.vlgmr.msra.gmra.mrb[24].mxu1 %vm402_vm2, %v4774_v33 }
 0x227   :  { %v2074_v4 = vpop.permute.xlu0 %2073  ;;  %4218 = vmatpush3.xpose.msk.msra.mxu0 %vm402_vm2, %v2302_v3  ;;  %4204 = vmatprep.mubr.msk.f32.mxu1 %vm4560_vm1, %v4559_v19 }
 0x228   :  { %4203 = vmatpush3.xpose.msk.msra.mxu1 %vm402_vm2, %v2074_v4  ;;  %4219 = vmatprep.mubr.msk.f32.mxu0 %vm4560_vm1, %v4559_v19 }
 0x229   :  { %4227 = vmatprep.subr.mxu0 %v4559_v19  ;;  %4212 = vmatprep.subr.mxu1 %v4559_v19 }
 0x22a   :  { %4220 = vmatmul.mubr.msk.f32.vlgmr.msra.gmra.mrb[28].mxu0 %vm402_vm2, %v4788_v36  ;;  %v2454_v5 = vpop.permute.xlu1 %2453 }
 0x22b   :  { %4205 = vmatmul.mubr.msk.f32.vlgmr.msra.gmra.mrb[26].mxu1 %vm402_vm2, %v4798_v39  ;;  %v2226_v6 = vpop.permute.xlu0 %2225  ;;  %4228 = vmatpush3.xpose.msk.msra.mxu0 %vm402_vm2, %v2454_v5 }
 0x22c   :  { %4213 = vmatpush3.xpose.msk.msra.mxu1 %vm402_vm2, %v2226_v6  ;;  %4214 = vmatprep.mubr.msk.f32.mxu1 %vm4560_vm1, %v4559_v19 }
 0x22d   :  { %4229 = vmatprep.mubr.msk.f32.mxu0 %vm4560_vm1, %v4559_v19  ;;  %4237 = vmatprep.subr.mxu0 %v4559_v19 }
 0x22e   :  { %4230 = vmatmul.mubr.msk.f32.vlgmr.msra.gmra.mrb[30].mxu0 %vm402_vm2, %v4808_v41  ;;  %v2606_v7 = vpop.permute.xlu1 %2605  ;;  %4222 = vmatprep.subr.mxu1 %v4559_v19 }
 0x22f   :  { %4215 = vmatmul.mubr.msk.f32.vlgmr.msra.gmra.mrb[28].mxu1 %vm402_vm2, %v4782_v35  ;;  %v2378_v8 = vpop.permute.xlu0 %2377  ;;  %4238 = vmatpush3.xpose.msk.msra.mxu0 %vm402_vm2, %v2606_v7 }
 0x230   :  { %4223 = vmatpush3.xpose.msk.msra.mxu1 %vm402_vm2, %v2378_v8  ;;  %4224 = vmatprep.mubr.msk.f32.mxu1 %vm4560_vm1, %v4559_v19 }
 0x231   :  { %4239 = vmatprep.mubr.msk.f32.mxu0 %vm4560_vm1, %v4559_v19  ;;  %4232 = vmatprep.subr.mxu1 %v4559_v19 }
 0x232   :  { %4240 = vmatmul.mubr.msk.f32.vlgmr.msra.gmra.mrb[32].mxu0 %vm402_vm2, %v4816_v42  ;;  %4247 = vmatprep.subr.mxu0 %v4559_v19 }
 0x233   :  { %4225 = vmatmul.mubr.msk.f32.vlgmr.msra.gmra.mrb[30].mxu1 %vm402_vm2, %v4796_v38  ;;  %v2530_v9 = vpop.permute.xlu0 %2529  ;;  %4249 = vmatprep.mubr.msk.f32.mxu0 %vm4560_vm1, %v4559_v19 }
 0x234   :  { %4233 = vmatpush3.xpose.msk.msra.mxu1 %vm402_vm2, %v2530_v9  ;;  %4234 = vmatprep.mubr.msk.f32.mxu1 %vm4560_vm1, %v4559_v19 }
 0x235   :  { %4242 = vmatprep.subr.mxu1 %v4559_v19 }
 0x236   :  { %v2758_v10 = vpop.permute.xlu1 %2757 }
 0x237   :  { %4235 = vmatmul.mubr.msk.f32.vlgmr.msra.gmra.mrb[32].mxu1 %vm402_vm2, %v4820_v43  ;;  %v2682_v11 = vpop.permute.xlu0 %2681  ;;  %4248 = vmatpush3.xpose.msk.msra.mxu0 %vm402_vm2, %v2758_v10 }
 0x238   :  { %4243 = vmatpush3.xpose.msk.msra.mxu1 %vm402_vm2, %v2682_v11  ;;  %4244 = vmatprep.mubr.msk.f32.mxu1 %vm4560_vm1, %v4559_v19 }
 0x239   :  { %4257 = vmatprep.subr.mxu0 %v4559_v19  ;;  %4252 = vmatprep.subr.mxu1 %v4559_v19 }
 0x23a   :  { %4250 = vmatmul.mubr.msk.f32.vlgmr.msra.gmra.mrb[34].mxu0 %vm402_vm2, %v4836_v47 }
 0x23b   :  { %4245 = vmatmul.mubr.msk.f32.vlgmr.msra.gmra.mrb[34].mxu1 %vm402_vm2, %v4828_v44  ;;  %4258 = vmatpush3.msra.mxu0 %v4643_v14 }
 0x23c   :  { %4259 = vmatprep.mubr.msk.f32.mxu0 %vm4560_vm1, %v4559_v19  ;;  %4253 = vmatpush3.msra.mxu1 %v4641_v13 }
 0x23d   :  { %4267 = vmatprep.subr.mxu0 %v4559_v19  ;;  %4254 = vmatprep.mubr.msk.f32.mxu1 %vm4560_vm1, %v4559_v19 }
 0x23e   :  { %4262 = vmatprep.subr.mxu1 %v4559_v19 }
 0x287   :  { %v5022_v12 = vpop.f32.mrb[0].mxu1 }
 0x288   :  { %v4096_v15 = vpop.f32.mrb[1].mxu1  ;;  %v2833_v16 = vsel %vm402_vm2, %v5022_v12, -inf }
 0x289   :  { %2834 = vmax.xlane.f32.xlu0 %v2833_v16 }
 0x28e   :  { %v5026_v14 = vpop.f32.mrb[2].mxu1 }
 0x28f   :  { %v4101_v17 = vpop.f32.mrb[3].mxu1  ;;  %v2836_v13 = vsel %vm402_vm2, %v5026_v14, -inf }
 0x290   :  { %2837 = vmax.xlane.f32.xlu1 %v2836_v13 }
 0x296   :  { %v5030_v18 = vpop.f32.mrb[4].mxu1 }
 0x297   :  { %v4106_v20 = vpop.f32.mrb[5].mxu1  ;;  %v2839_v21 = vsel %vm402_vm2, %v5030_v18, -inf }
 0x298   :  { %2840 = vmax.xlane.f32.xlu1 %v2839_v21 }
 0x29a   :  { %v5034_v22 = vpop.f32.mrb[6].mxu1 }
 0x29b   :  { %v4111_v23 = vpop.f32.mrb[7].mxu1  ;;  %v2842_v36 = vsel %vm402_vm2, %v5034_v22, -inf }
 0x29e   :  { %v5036_v24 = vpop.f32.mrb[8].mxu1  ;;  %v5038_v25 = vpop.f32.mrb[8].mxu0 }
 0x29f   :  { %v4116_v26 = vpop.f32.mrb[9].mxu1  ;;  %v4121_v27 = vpop.f32.mrb[9].mxu0  ;;  %v2848_v28 = vsel %vm402_vm2, %v5038_v25, -inf  ;;  %v2845_v29 = vsel %vm402_vm2, %v5036_v24, -inf }
 0x2a0   :  { %2849 = vmax.xlane.f32.xlu0 %v2848_v28  ;;  %2846 = vmax.xlane.f32.xlu1 %v2845_v29 }
 0x2a2   :  { %v5044_v30 = vpop.f32.mrb[10].mxu1  ;;  %v5046_v31 = vpop.f32.mrb[10].mxu0 }
 0x2a3   :  { %v4126_v32 = vpop.f32.mrb[11].mxu1  ;;  %v4131_v33 = vpop.f32.mrb[11].mxu0  ;;  %v2854_v34 = vsel %vm402_vm2, %v5046_v31, -inf  ;;  %v2851_v35 = vsel %vm402_vm2, %v5044_v30, -inf }
 0x2a4   :  { %2855 = vmax.xlane.f32.xlu0 %v2854_v34  ;;  %2852 = vmax.xlane.f32.xlu1 %v2851_v35 }
 0x2a8   :  { %2843 = vmax.xlane.f32.xlu0 %v2842_v36 }
 0x2d9   :  { %v5054_v37 = vpop.f32.mrb[12].mxu0 }
 0x2da   :  { %v4141_v38 = vpop.f32.mrb[13].mxu0  ;;  %v2860_v39 = vsel %vm402_vm2, %v5054_v37, -inf }
 0x2db   :  { %2861 = vmax.xlane.f32.xlu0 %v2860_v39 }
 0x2dd   :  { %v5058_v40 = vpop.f32.mrb[12].mxu1  ;;  %v5060_v41 = vpop.f32.mrb[14].mxu0 }
 0x2de   :  { %v4136_v42 = vpop.f32.mrb[13].mxu1  ;;  %v4151_v43 = vpop.f32.mrb[15].mxu0  ;;  %v2857_v44 = vsel %vm402_vm2, %v5058_v40, -inf  ;;  %v2866_v47 = vsel %vm402_vm2, %v5060_v41, -inf }
 0x2df   :  { %2858 = vmax.xlane.f32.xlu0 %v2857_v44 }
 0x2e1   :  { %v5064_v45 = vpop.f32.mrb[14].mxu1 }
 0x2e2   :  { %v4146_v46 = vpop.f32.mrb[15].mxu1  ;;  %v2863_v48 = vsel %vm402_vm2, %v5064_v45, -inf }
 0x2e3   :  { %2867 = vmax.xlane.f32.xlu0 %v2866_v47  ;;  %2864 = vmax.xlane.f32.xlu1 %v2863_v48 }
 0x2e5   :  { %v5070_v49 = vpop.f32.mrb[16].mxu0 }
 0x2e6   :  { %v4161_v50 = vpop.f32.mrb[17].mxu0  ;;  %v2872_v51 = vsel %vm402_vm2, %v5070_v49, -inf }
 0x2e7   :  { %2873 = vmax.xlane.f32.xlu0 %v2872_v51 }
 0x2e9   :  { %v5074_v52 = vpop.f32.mrb[16].mxu1  ;;  %v5076_v53 = vpop.f32.mrb[18].mxu0 }
 0x2ea   :  { %v4156_v54 = vpop.f32.mrb[17].mxu1  ;;  %v4171_v55 = vpop.f32.mrb[19].mxu0  ;;  %v2878_v56 = vsel %vm402_vm2, %v5076_v53, -inf  ;;  %v2869_v57 = vsel %vm402_vm2, %v5074_v52, -inf }
 0x2eb   :  { %2879 = vmax.xlane.f32.xlu0 %v2878_v56  ;;  %2870 = vmax.xlane.f32.xlu1 %v2869_v57 }
 0x2ed   :  { %v5082_v58 = vpop.f32.mrb[18].mxu1  ;;  %v5084_v59 = vpop.f32.mrb[20].mxu0 }
 0x2ee   :  { %v4166_v60 = vpop.f32.mrb[19].mxu1  ;;  %v4181_v61 = vpop.f32.mrb[21].mxu0  ;;  %v2884_v62 = vsel %vm402_vm2, %v5084_v59, -inf  ;;  %v2875_v63 = vsel %vm402_vm2, %v5082_v58, -inf }
 0x2ef   :  { %2885 = vmax.xlane.f32.xlu0 %v2884_v62  ;;  %2876 = vmax.xlane.f32.xlu1 %v2875_v63 }
 0x2f1   :  { %v5090_v0 = vpop.f32.mrb[20].mxu1  ;;  %v5092_v1 = vpop.f32.mrb[22].mxu0 }
 0x2f2   :  { %v4176_v2 = vpop.f32.mrb[21].mxu1  ;;  %v4191_v3 = vpop.f32.mrb[23].mxu0  ;;  %v2890_v4 = vsel %vm402_vm2, %v5092_v1, -inf  ;;  %v2881_v5 = vsel %vm402_vm2, %v5090_v0, -inf }
 0x2f3   :  { %2891 = vmax.xlane.f32.xlu0 %v2890_v4  ;;  %2882 = vmax.xlane.f32.xlu1 %v2881_v5 }
 0x2f5   :  { %v5098_v6 = vpop.f32.mrb[22].mxu1  ;;  %v5100_v7 = vpop.f32.mrb[24].mxu0 }
 0x2f6   :  { %v4186_v8 = vpop.f32.mrb[23].mxu1  ;;  %v4201_v9 = vpop.f32.mrb[25].mxu0  ;;  %v2896_v10 = vsel %vm402_vm2, %v5100_v7, -inf  ;;  %v2887_v11 = vsel %vm402_vm2, %v5098_v6, -inf }
 0x2f7   :  { %2897 = vmax.xlane.f32.xlu0 %v2896_v10  ;;  %2888 = vmax.xlane.f32.xlu1 %v2887_v11 }
 0x2f9   :  { %v5106_v15 = vpop.f32.mrb[24].mxu1  ;;  %v5108_v16 = vpop.f32.mrb[26].mxu0 }
 0x2fa   :  { %v4196_v17 = vpop.f32.mrb[25].mxu1  ;;  %v4211_v13 = vpop.f32.mrb[27].mxu0  ;;  %v2902_v20 = vsel %vm402_vm2, %v5108_v16, -inf  ;;  %v2893_v21 = vsel %vm402_vm2, %v5106_v15, -inf }
 0x2fb   :  { %2903 = vmax.xlane.f32.xlu0 %v2902_v20  ;;  %2894 = vmax.xlane.f32.xlu1 %v2893_v21 }
 0x2fd   :  { %v5114_v23 = vpop.f32.mrb[28].mxu0 }
 0x2fe   :  { %v5116_v26 = vpop.f32.mrb[26].mxu1  ;;  %v4221_v27 = vpop.f32.mrb[29].mxu0  ;;  %v2908_v28 = vsel %vm402_vm2, %v5114_v23, -inf }
 0x2ff   :  { %v4206_v29 = vpop.f32.mrb[27].mxu1  ;;  %2909 = vmax.xlane.f32.xlu0 %v2908_v28  ;;  %v2899_v32 = vsel %vm402_vm2, %v5116_v26, -inf }
 0x300   :  { %2900 = vmax.xlane.f32.xlu1 %v2899_v32 }
 0x301   :  { %v5122_v33 = vpop.f32.mrb[30].mxu0 }
 0x302   :  { %v5124_v34 = vpop.f32.mrb[28].mxu1  ;;  %v4231_v35 = vpop.f32.mrb[31].mxu0  ;;  %v2914_v36 = vsel %vm402_vm2, %v5122_v33, -inf }
 0x303   :  { %v4216_v38 = vpop.f32.mrb[29].mxu1  ;;  %2915 = vmax.xlane.f32.xlu0 %v2914_v36  ;;  %v2905_v39 = vsel %vm402_vm2, %v5124_v34, -inf }
 0x304   :  { %2906 = vmax.xlane.f32.xlu1 %v2905_v39 }
 0x305   :  { %v5130_v42 = vpop.f32.mrb[32].mxu0 }
 0x306   :  { %v5132_v43 = vpop.f32.mrb[30].mxu1  ;;  %v4241_v44 = vpop.f32.mrb[33].mxu0  ;;  %v2920_v46 = vsel %vm402_vm2, %v5130_v42, -inf }
 0x307   :  { %v4226_v47 = vpop.f32.mrb[31].mxu1  ;;  %2921 = vmax.xlane.f32.xlu0 %v2920_v46  ;;  %v2911_v48 = vsel %vm402_vm2, %v5132_v43, -inf }
 0x308   :  { %2912 = vmax.xlane.f32.xlu1 %v2911_v48 }
 0x30a   :  { %v5138_v50 = vpop.f32.mrb[32].mxu1 }
 0x30b   :  { %v4236_v51 = vpop.f32.mrb[33].mxu1  ;;  %v2917_v54 = vsel %vm402_vm2, %v5138_v50, -inf }
 0x30c   :  { %2918 = vmax.xlane.f32.xlu1 %v2917_v54 }
 0x30d   :  { %v5142_v55 = vpop.f32.mrb[34].mxu0 }
 0x30e   :  { %v5144_v56 = vpop.f32.mrb[34].mxu1  ;;  %v4251_v57 = vpop.f32.mrb[35].mxu0  ;;  %v2926_v60 = vsel %vm402_vm2, %v5142_v55, -inf }
 0x30f   :  { %v4246_v61 = vpop.f32.mrb[35].mxu1  ;;  %2927 = vmax.xlane.f32.xlu0 %v2926_v60  ;;  %v2923_v62 = vsel %vm402_vm2, %v5144_v56, -inf }
 0x310   :  { %2924 = vmax.xlane.f32.xlu1 %v2923_v62 }
 0x316   :  { %v2835_v63 = vpop.xlane.xlu0 %2834 }
 0x317   :  { %v2929_v2 = vsub.f32 %v5022_v12, %v2835_v63 }
 0x319   :  { %v2961_v3 = vmul.f32 1.442695, %v2929_v2 }
 0x31b   :  { %4322 = vpow2.f32 %v2961_v3 }
 0x31d   :  { %v2838_v4 = vpop.xlane.xlu1 %2837 }
 0x31e   :  { %v2930_v5 = vsub.f32 %v5026_v14, %v2838_v4 }
 0x320   :  { %v2963_v8 = vmul.f32 1.442695, %v2930_v5 }
 0x322   :  { %4324 = vpow2.f32 %v2963_v8 }
 0x325   :  { %v5152_v9 = vpop.eup %4322  ;;  %v2841_v10 = vpop.xlane.xlu1 %2840 }
 0x326   :  { %v2931_v11 = vsub.f32 %v5030_v18, %v2841_v10  ;;  %v3025_v17 = vsel %vm402_vm2, %v5152_v9, 0.0 }
 0x327   :  { %3026 = vadd.xlane.f32.xlu1 %v3025_v17 }
 0x328   :  { %v2965_v13 = vmul.f32 1.442695, %v2931_v11 }
 0x32a   :  { %4326 = vpow2.f32 %v2965_v13 }
 0x32c   :  { %v5157_v20 = vpop.eup %4324 }
 0x32d   :  { %v2847_v12 = vpop.xlane.xlu1 %2846  ;;  %v2850_v21 = vpop.xlane.xlu0 %2849  ;;  %v3028_v14 = vsel %vm402_vm2, %v5157_v20, 0.0 }
 0x32e   :  { %v2933_v27 = vsub.f32 %v5036_v24, %v2847_v12  ;;  %v2934_v28 = vsub.f32 %v5038_v25, %v2850_v21  ;;  %3029 = vadd.xlane.f32.xlu0 %v3028_v14 }
 0x330   :  { %v2969_v29 = vmul.f32 1.442695, %v2933_v27  ;;  %v2971_v18 = vmul.f32 1.442695, %v2934_v28 }
 0x331   :  { %v2853_v32 = vpop.xlane.xlu1 %2852  ;;  %v2856_v35 = vpop.xlane.xlu0 %2855 }
 0x332   :  { %4328 = vpow2.f32 %v2969_v29  ;;  %v2935_v36 = vsub.f32 %v5044_v30, %v2853_v32  ;;  %v2936_v38 = vsub.f32 %v5046_v31, %v2856_v35 }
 0x333   :  { %4330 = vpow2.f32 %v2971_v18 }
 0x334   :  { %v5165_v39 = vpop.eup %4326  ;;  %v2973_v44 = vmul.f32 1.442695, %v2935_v36  ;;  %v2975_v46 = vmul.f32 1.442695, %v2936_v38 }
 0x335   :  { %v2844_v47 = vpop.xlane.xlu0 %2843  ;;  %v3031_v24 = vsel %vm402_vm2, %v5165_v39, 0.0 }
 0x336   :  { %4332 = vpow2.f32 %v2973_v44  ;;  %v2932_v25 = vsub.f32 %v5034_v22, %v2844_v47  ;;  %3032 = vadd.xlane.f32.xlu1 %v3031_v24 }
 0x337   :  { %4334 = vpow2.f32 %v2975_v46 }
 0x338   :  { %v2967_v48 = vmul.f32 1.442695, %v2932_v25 }
 0x33a   :  { %4336 = vpow2.f32 %v2967_v48 }
 0x33c   :  { %v5170_v51 = vpop.eup %4328 }
 0x33d   :  { %v5172_v30 = vpop.eup %4330  ;;  %v3037_v31 = vsel %vm402_vm2, %v5170_v51, 0.0 }
 0x33e   :  { %3038 = vadd.xlane.f32.xlu1 %v3037_v31  ;;  %v3040_v54 = vsel %vm402_vm2, %v5172_v30, 0.0 }
 0x33f   :  { %3041 = vadd.xlane.f32.xlu0 %v3040_v54 }
 0x340   :  { %v5178_v57 = vpop.eup %4332 }
 0x341   :  { %v5180_v60 = vpop.eup %4334  ;;  %v3043_v22 = vsel %vm402_vm2, %v5178_v57, 0.0 }
 0x342   :  { %3044 = vadd.xlane.f32.xlu1 %v3043_v22  ;;  %v3046_v61 = vsel %vm402_vm2, %v5180_v60, 0.0 }
 0x343   :  { %3047 = vadd.xlane.f32.xlu0 %v3046_v61 }
 0x344   :  { %v5186_v62 = vpop.eup %4336 }
 0x345   :  { %v3034_v63 = vsel %vm402_vm2, %v5186_v62, 0.0 }
 0x347   :  { %3035 = vadd.xlane.f32.xlu0 %v3034_v63 }
 0x368   :  { %v2862_v2 = vpop.xlane.xlu0 %2861 }
 0x369   :  { %v2938_v3 = vsub.f32 %v5054_v37, %v2862_v2 }
 0x36b   :  { %v2979_v4 = vmul.f32 1.442695, %v2938_v3 }
 0x36c   :  { %v2859_v5 = vpop.xlane.xlu0 %2858 }
 0x36d   :  { %4338 = vpow2.f32 %v2979_v4  ;;  %v2937_v8 = vsub.f32 %v5058_v40, %v2859_v5 }
 0x36f   :  { %v2977_v10 = vmul.f32 1.442695, %v2937_v8 }
 0x370   :  { %v2865_v11 = vpop.xlane.xlu1 %2864  ;;  %v2868_v17 = vpop.xlane.xlu0 %2867 }
 0x371   :  { %4340 = vpow2.f32 %v2977_v10  ;;  %v2939_v13 = vsub.f32 %v5064_v45, %v2865_v11  ;;  %v2940_v12 = vsub.f32 %v5060_v41, %v2868_v17 }
 0x373   :  { %v2981_v21 = vmul.f32 1.442695, %v2939_v13  ;;  %v2983_v14 = vmul.f32 1.442695, %v2940_v12 }
 0x374   :  { %v2874_v27 = vpop.xlane.xlu0 %2873 }
 0x375   :  { %4342 = vpow2.f32 %v2981_v21  ;;  %v2942_v28 = vsub.f32 %v5070_v49, %v2874_v27 }
 0x376   :  { %4344 = vpow2.f32 %v2983_v14 }
 0x377   :  { %v5195_v37 = vpop.eup %4338  ;;  %v2987_v29 = vmul.f32 1.442695, %v2942_v28 }
 0x378   :  { %v2871_v18 = vpop.xlane.xlu1 %2870  ;;  %v2880_v40 = vpop.xlane.xlu0 %2879  ;;  %v3052_v32 = vsel %vm402_vm2, %v5195_v37, 0.0 }
 0x379   :  { %4346 = vpow2.f32 %v2987_v29  ;;  %v2941_v45 = vsub.f32 %v5074_v52, %v2871_v18  ;;  %v2944_v41 = vsub.f32 %v5076_v53, %v2880_v40  ;;  %3053 = vadd.xlane.f32.xlu0 %v3052_v32 }
 0x37b   :  { %v5201_v35 = vpop.eup %4340  ;;  %v2985_v36 = vmul.f32 1.442695, %v2941_v45  ;;  %v2991_v38 = vmul.f32 1.442695, %v2944_v41 }
 0x37c   :  { %v2877_v49 = vpop.xlane.xlu1 %2876  ;;  %v2886_v44 = vpop.xlane.xlu0 %2885  ;;  %v3049_v46 = vsel %vm402_vm2, %v5201_v35, 0.0 }
 0x37d   :  { %4348 = vpow2.f32 %v2985_v36  ;;  %v2943_v47 = vsub.f32 %v5082_v58, %v2877_v49  ;;  %v2946_v24 = vsub.f32 %v5084_v59, %v2886_v44  ;;  %3050 = vadd.xlane.f32.xlu1 %v3049_v46 }
 0x37e   :  { %4350 = vpow2.f32 %v2991_v38 }
 0x37f   :  { %v5207_v52 = vpop.eup %4342  ;;  %v2989_v53 = vmul.f32 1.442695, %v2943_v47  ;;  %v2995_v25 = vmul.f32 1.442695, %v2946_v24 }
 0x380   :  { %v5209_v48 = vpop.eup %4344  ;;  %v2883_v31 = vpop.xlane.xlu1 %2882  ;;  %v3055_v22 = vsel %vm402_vm2, %v5207_v52, 0.0 }
 0x381   :  { %v2892_v54 = vpop.xlane.xlu0 %2891  ;;  %4352 = vpow2.f32 %v2989_v53  ;;  %v2945_v61 = vsub.f32 %v5090_v0, %v2883_v31  ;;  %3056 = vadd.xlane.f32.xlu1 %v3055_v22  ;;  %v3058_v59 = vsel %vm402_vm2, %v5209_v48, 0.0 }
 0x382   :  { %v2948_v58 = vsub.f32 %v5092_v1, %v2892_v54  ;;  %4354 = vpow2.f32 %v2995_v25  ;;  %3059 = vadd.xlane.f32.xlu0 %v3058_v59 }
 0x383   :  { %v5217_v63 = vpop.eup %4346  ;;  %v2993_v2 = vmul.f32 1.442695, %v2945_v61 }
 0x384   :  { %v2999_v3 = vmul.f32 1.442695, %v2948_v58  ;;  %v2889_v4 = vpop.xlane.xlu1 %2888  ;;  %v3064_v8 = vsel %vm402_vm2, %v5217_v63, 0.0 }
 0x385   :  { %v2898_v5 = vpop.xlane.xlu0 %2897  ;;  %4356 = vpow2.f32 %v2993_v2  ;;  %v2947_v0 = vsub.f32 %v5098_v6, %v2889_v4 }
 0x386   :  { %v2950_v1 = vsub.f32 %v5100_v7, %v2898_v5  ;;  %4358 = vpow2.f32 %v2999_v3  ;;  %3065 = vadd.xlane.f32.xlu0 %v3064_v8 }
 0x387   :  { %v5223_v10 = vpop.eup %4348  ;;  %v2997_v11 = vmul.f32 1.442695, %v2947_v0 }
 0x388   :  { %v3003_v17 = vmul.f32 1.442695, %v2950_v1  ;;  %v5225_v13 = vpop.eup %4350  ;;  %v2895_v12 = vpop.xlane.xlu1 %2894  ;;  %v3061_v14 = vsel %vm402_vm2, %v5223_v10, 0.0 }
 0x389   :  { %v2904_v21 = vpop.xlane.xlu0 %2903  ;;  %4360 = vpow2.f32 %v2997_v11  ;;  %v2949_v27 = vsub.f32 %v5106_v15, %v2895_v12  ;;  %3062 = vadd.xlane.f32.xlu1 %v3061_v14  ;;  %v3070_v7 = vsel %vm402_vm2, %v5225_v13, 0.0 }
 0x38a   :  { %v2952_v6 = vsub.f32 %v5108_v16, %v2904_v21  ;;  %4362 = vpow2.f32 %v3003_v17  ;;  %3071 = vadd.xlane.f32.xlu0 %v3070_v7 }
 0x38b   :  { %v5233_v28 = vpop.eup %4352  ;;  %v3001_v29 = vmul.f32 1.442695, %v2949_v27 }
 0x38c   :  { %v3007_v18 = vmul.f32 1.442695, %v2952_v6  ;;  %v5235_v40 = vpop.eup %4354  ;;  %v3067_v45 = vsel %vm402_vm2, %v5233_v28, 0.0 }
 0x38d   :  { %v2910_v32 = vpop.xlane.xlu0 %2909  ;;  %4364 = vpow2.f32 %v3001_v29  ;;  %v2901_v15 = vpop.xlane.xlu1 %2900  ;;  %3068 = vadd.xlane.f32.xlu1 %v3067_v45  ;;  %v3076_v41 = vsel %vm402_vm2, %v5235_v40, 0.0 }
 0x38e   :  { %v2954_v16 = vsub.f32 %v5114_v23, %v2910_v32  ;;  %4366 = vpow2.f32 %v3007_v18  ;;  %v2951_v36 = vsub.f32 %v5116_v26, %v2901_v15  ;;  %3077 = vadd.xlane.f32.xlu0 %v3076_v41 }
 0x38f   :  { %v5243_v38 = vpop.eup %4356 }
 0x390   :  { %v3011_v49 = vmul.f32 1.442695, %v2954_v16  ;;  %v5245_v44 = vpop.eup %4358  ;;  %v3005_v46 = vmul.f32 1.442695, %v2951_v36  ;;  %v3073_v24 = vsel %vm402_vm2, %v5243_v38, 0.0 }
 0x391   :  { %v2916_v47 = vpop.xlane.xlu0 %2915  ;;  %v2907_v23 = vpop.xlane.xlu1 %2906  ;;  %3074 = vadd.xlane.f32.xlu1 %v3073_v24  ;;  %v3082_v25 = vsel %vm402_vm2, %v5245_v44, 0.0 }
 0x392   :  { %4368 = vpow2.f32 %v3011_v49  ;;  %v2956_v53 = vsub.f32 %v5122_v33, %v2916_v47  ;;  %v2953_v26 = vsub.f32 %v5124_v34, %v2907_v23  ;;  %3083 = vadd.xlane.f32.xlu0 %v3082_v25 }
 0x393   :  { %4370 = vpow2.f32 %v3005_v46  ;;  %v5253_v31 = vpop.eup %4360 }
 0x394   :  { %v3015_v54 = vmul.f32 1.442695, %v2956_v53  ;;  %v5255_v22 = vpop.eup %4362  ;;  %v3009_v61 = vmul.f32 1.442695, %v2953_v26  ;;  %v3079_v59 = vsel %vm402_vm2, %v5253_v31, 0.0 }
 0x395   :  { %v2922_v58 = vpop.xlane.xlu0 %2921  ;;  %v2913_v33 = vpop.xlane.xlu1 %2912  ;;  %3080 = vadd.xlane.f32.xlu1 %v3079_v59  ;;  %v3088_v3 = vsel %vm402_vm2, %v5255_v22, 0.0 }
 0x396   :  { %4372 = vpow2.f32 %v3015_v54  ;;  %v2958_v2 = vsub.f32 %v5130_v42, %v2922_v58  ;;  %v2955_v34 = vsub.f32 %v5132_v43, %v2913_v33  ;;  %3089 = vadd.xlane.f32.xlu0 %v3088_v3 }
 0x397   :  { %4374 = vpow2.f32 %v3009_v61  ;;  %v5263_v4 = vpop.eup %4364 }
 0x398   :  { %v3019_v5 = vmul.f32 1.442695, %v2958_v2  ;;  %v5265_v8 = vpop.eup %4366  ;;  %v3013_v0 = vmul.f32 1.442695, %v2955_v34  ;;  %v3085_v1 = vsel %vm402_vm2, %v5263_v4, 0.0 }
 0x399   :  { %v2919_v11 = vpop.xlane.xlu1 %2918  ;;  %3086 = vadd.xlane.f32.xlu1 %v3085_v1  ;;  %v3094_v42 = vsel %vm402_vm2, %v5265_v8, 0.0 }
 0x39a   :  { %4376 = vpow2.f32 %v3019_v5  ;;  %v2957_v17 = vsub.f32 %v5138_v50, %v2919_v11  ;;  %3095 = vadd.xlane.f32.xlu0 %v3094_v42 }
 0x39b   :  { %4378 = vpow2.f32 %v3013_v0 }
 0x39c   :  { %v5272_v43 = vpop.eup %4368  ;;  %v3017_v21 = vmul.f32 1.442695, %v2957_v17  ;;  %v2928_v14 = vpop.xlane.xlu0 %2927 }
 0x39d   :  { %v5274_v12 = vpop.eup %4370  ;;  %v3100_v27 = vsel %vm402_vm2, %v5272_v43, 0.0  ;;  %v2925_v6 = vpop.xlane.xlu1 %2924  ;;  %v2960_v7 = vsub.f32 %v5142_v55, %v2928_v14 }
 0x39e   :  { %v3091_v29 = vsel %vm402_vm2, %v5274_v12, 0.0  ;;  %4380 = vpow2.f32 %v3017_v21  ;;  %v2959_v18 = vsub.f32 %v5144_v56, %v2925_v6  ;;  %3101 = vadd.xlane.f32.xlu0 %v3100_v27 }
 0x39f   :  { %3092 = vadd.xlane.f32.xlu1 %v3091_v29  ;;  %v3023_v32 = vmul.f32 1.442695, %v2960_v7 }
 0x3a0   :  { %v5282_v50 = vpop.eup %4372  ;;  %v3021_v15 = vmul.f32 1.442695, %v2959_v18 }
 0x3a1   :  { %v5284_v45 = vpop.eup %4374  ;;  %v3106_v16 = vsel %vm402_vm2, %v5282_v50, 0.0  ;;  %4382 = vpow2.f32 %v3023_v32 }
 0x3a2   :  { %v3097_v55 = vsel %vm402_vm2, %v5284_v45, 0.0  ;;  %4384 = vpow2.f32 %v3021_v15  ;;  %3107 = vadd.xlane.f32.xlu0 %v3106_v16 }
 0x3a3   :  { %3098 = vadd.xlane.f32.xlu1 %v3097_v55 }
 0x3a4   :  { %v5290_v41 = vpop.eup %4376 }
 0x3a5   :  { %v5292_v56 = vpop.eup %4378  ;;  %v3112_v36 = vsel %vm402_vm2, %v5290_v41, 0.0 }
 0x3a6   :  { %v3103_v49 = vsel %vm402_vm2, %v5292_v56, 0.0  ;;  %3113 = vadd.xlane.f32.xlu0 %v3112_v36 }
 0x3a7   :  { %3104 = vadd.xlane.f32.xlu1 %v3103_v49 }
 0x3a8   :  { %v5298_v46 = vpop.eup %4380 }
 0x3a9   :  { %v3109_v47 = vsel %vm402_vm2, %v5298_v46, 0.0 }
 0x3ab   :  { %3110 = vadd.xlane.f32.xlu1 %v3109_v47  ;;  %v5302_v24 = vpop.eup %4382 }
 0x3ac   :  { %v5304_v23 = vpop.eup %4384  ;;  %v3118_v53 = vsel %vm402_vm2, %v5302_v24, 0.0 }
 0x3ad   :  { %v3115_v25 = vsel %vm402_vm2, %v5304_v23, 0.0  ;;  %3119 = vadd.xlane.f32.xlu0 %v3118_v53 }
 0x3af   :  { %3116 = vadd.xlane.f32.xlu1 %v3115_v25 }
 0x3b4   :  { %v3027_v54 = vpop.xlane.xlu1 %3026 }
 0x3b5   :  { %v3121_v17 = vmul.f32 4.0, %v3027_v54 }
 0x3b7   :  { %4386 = vrcp.f32 %v3121_v17 }
 0x3bb   :  { %v3030_v26 = vpop.xlane.xlu0 %3029 }
 0x3bc   :  { %v3122_v14 = vmul.f32 4.0, %v3030_v26 }
 0x3be   :  { %4388 = vrcp.f32 %v3122_v14 }
 0x3c3   :  { %v3033_v58 = vpop.xlane.xlu1 %3032 }
 0x3c4   :  { %v3123_v27 = vmul.f32 4.0, %v3033_v58 }
 0x3c6   :  { %4390 = vrcp.f32 %v3123_v27 }
 0x3cb   :  { %v3039_v33 = vpop.xlane.xlu1 %3038 }
 0x3cc   :  { %v3042_v61 = vpop.xlane.xlu0 %3041  ;;  %v3125_v6 = vmul.f32 4.0, %v3039_v33  ;;  %v4387_v33 = vpop.eup %4386 }
 0x3cd   :  { %v3126_v29 = vmul.f32 4.0, %v3042_v61 }
 0x3ce   :  { %4392 = vrcp.f32 %v3125_v6 }
 0x3cf   :  { %v3045_v3 = vpop.xlane.xlu1 %3044  ;;  %4394 = vrcp.f32 %v3126_v29 }
 0x3d0   :  { %v3048_v59 = vpop.xlane.xlu0 %3047  ;;  %v3127_v32 = vmul.f32 4.0, %v3045_v3  ;;  %v4389_v3 = vpop.eup %4388 }
 0x3d1   :  { %v4391_v17 = vpop.eup %4390 }
 0x3d2   :  { %4396 = vrcp.f32 %v3127_v32 }
 0x3d4   :  { %v3036_v2 = vpop.xlane.xlu0 %3035 }
 0x3d5   :  { %v3124_v15 = vmul.f32 4.0, %v3036_v2  ;;  %v3128_v2 = vmul.f32 4.0, %v3048_v59 }
 0x3d7   :  { %4398 = vrcp.f32 %v3124_v15  ;;  %v3186_v15 = vmul.f32 %v4389_v3, %v5157_v20 }
 0x406   :  { %v3054_v34 = vpop.xlane.xlu0 %3053 }
 0x407   :  { %v3130_v16 = vmul.f32 4.0, %v3054_v34 }
 0x409   :  { %4400 = vrcp.f32 %v3130_v16 }
 0x40a   :  { %v3051_v5 = vpop.xlane.xlu1 %3050 }
 0x40b   :  { %v3129_v36 = vmul.f32 4.0, %v3051_v5 }
 0x40d   :  { %4402 = vrcp.f32 %v3129_v36 }
 0x40e   :  { %v3057_v1 = vpop.xlane.xlu1 %3056 }
 0x40f   :  { %v3060_v0 = vpop.xlane.xlu0 %3059  ;;  %v3131_v47 = vmul.f32 4.0, %v3057_v1 }
 0x410   :  { %v3132_v53 = vmul.f32 4.0, %v3060_v0  ;;  %v4393_v0 = vpop.eup %4392 }
 0x411   :  { %4404 = vrcp.f32 %v3131_v47  ;;  %v4395_v27 = vpop.eup %4394 }
 0x412   :  { %4406 = vrcp.f32 %v3132_v53  ;;  %v4397_v29 = vpop.eup %4396 }
 0x413   :  { %v3066_v11 = vpop.xlane.xlu0 %3065  ;;  %v4399_v32 = vpop.eup %4398 }
 0x414   :  { %v3134_v25 = vmul.f32 4.0, %v3066_v11  ;;  %v4401_v36 = vpop.eup %4400 }
 0x416   :  { %v3063_v42 = vpop.xlane.xlu1 %3062  ;;  %4408 = vrcp.f32 %v3134_v25 }
 0x417   :  { %v3072_v21 = vpop.xlane.xlu0 %3071  ;;  %v3133_v34 = vmul.f32 4.0, %v3063_v42  ;;  %v3187_v42 = vmul.f32 %v4391_v17, %v5165_v39  ;;  %v4403_v53 = vpop.eup %4402  ;;  %v3194_v39 = vmul.f32 %v4401_v36, %v5195_v37  ;;  %v3190_v17 = vmul.f32 %v4395_v27, %v5172_v30 }
 0x418   :  { %v3136_v59 = vmul.f32 4.0, %v3072_v21 }
 0x419   :  { %v3231_v20 = vsel %vm402_vm2, %v3187_v42, 0.0 }
 0x41a   :  { %v3069_v7 = vpop.xlane.xlu1 %3068 }
 0x41b   :  { %v3078_v18 = vpop.xlane.xlu0 %3077 }
 0x41c   :  { %v3138_v54 = vmul.f32 4.0, %v3078_v18  ;;  %v3185_v18 = vmul.f32 %v4387_v33, %v5152_v9 }
 0x41e   :  { %v3075_v55 = vpop.xlane.xlu1 %3074  ;;  %4410 = vrcp.f32 %v3138_v54  ;;  %v3217_v9 = vsel %vm402_vm2, %v3185_v18, 0.0  ;;  %v3224_v54 = vsel %vm402_vm2, %v3186_v15, 0.0  ;;  %v3225_v15 = vsel %vm402_vm2, %v3194_v39, 0.0 }
 0x41f   :  { %v3084_v49 = vpop.xlane.xlu0 %3083  ;;  %v3137_v58 = vmul.f32 4.0, %v3075_v55 }
 0x420   :  { %v3140_v1 = vmul.f32 4.0, %v3084_v49  ;;  %v3135_v49 = vmul.f32 4.0, %v3069_v7 }
 0x421   :  { %4412 = vrcp.f32 %v3137_v58 }
 0x422   :  { %v3081_v26 = vpop.xlane.xlu1 %3080  ;;  %4414 = vrcp.f32 %v3128_v2 }
 0x423   :  { %v3090_v61 = vpop.xlane.xlu0 %3089  ;;  %v3139_v11 = vmul.f32 4.0, %v3081_v26  ;;  %4416 = vrcp.f32 %v3133_v34  ;;  %v4405_v26 = vpop.eup %4404 }
 0x424   :  { %v3142_v6 = vmul.f32 4.0, %v3090_v61  ;;  %4418 = vrcp.f32 %v3140_v1  ;;  %v4407_v21 = vpop.eup %4406  ;;  %v3195_v37 = vmul.f32 %v4405_v26, %v5207_v52 }
 0x425   :  { %4420 = vrcp.f32 %v3139_v11  ;;  %v4409_v7 = vpop.eup %4408  ;;  %v3196_v18 = vmul.f32 %v4407_v21, %v5209_v48  ;;  %v3252_v48 = vsel %vm402_vm2, %v3190_v17, 0.0 }
 0x426   :  { %v3087_v5 = vpop.xlane.xlu1 %3086  ;;  %4422 = vrcp.f32 %v3142_v6  ;;  %v3193_v6 = vmul.f32 %v4403_v53, %v5201_v35  ;;  %v3232_v36 = vsel %vm402_vm2, %v3195_v37, 0.0 }
 0x427   :  { %v3096_v14 = vpop.xlane.xlu0 %3095  ;;  %v3141_v25 = vmul.f32 4.0, %v3087_v5  ;;  %4424 = vrcp.f32 %v3136_v59  ;;  %v5318_v5 = vmul.f32 %v4393_v0, %v5170_v51  ;;  %v3198_v51 = vmul.f32 %v4409_v7, %v5217_v63 }
 0x428   :  { %v3144_v33 = vmul.f32 4.0, %v3096_v14  ;;  %v4411_v34 = vpop.eup %4410  ;;  %v3188_v14 = vmul.f32 %v4399_v32, %v5186_v62  ;;  %v3218_v63 = vsel %vm402_vm2, %v3193_v6, 0.0  ;;  %v3233_v7 = vadd.f32 %v3232_v36, %v3231_v20 }
 0x429   :  { %v3202_v42 = vmul.f32 %v4411_v34, %v5235_v40 }
 0x42a   :  { %v3238_v53 = vsel %vm402_vm2, %v3188_v14, 0.0 }
 0x42b   :  { %v3102_v55 = vpop.xlane.xlu0 %3101  ;;  %v4413_v11 = vpop.eup %4412  ;;  %v3227_v26 = vsel %vm402_vm2, %v3202_v42, 0.0 }
 0x42c   :  { %v3093_v16 = vpop.xlane.xlu1 %3092  ;;  %v3146_v47 = vmul.f32 4.0, %v3102_v55  ;;  %v4415_v59 = vpop.eup %4414  ;;  %v5330_v55 = vmul.f32 %v4397_v29, %v5178_v57  ;;  %v3201_v62 = vmul.f32 %v4413_v11, %v5243_v38  ;;  %v3253_v38 = vsel %vm402_vm2, %v3198_v51, 0.0 }
 0x42d   :  { %v3143_v1 = vmul.f32 4.0, %v3093_v16  ;;  %v4417_v27 = vpop.eup %4416  ;;  %v3254_v11 = vadd.f32 %v3253_v38, %v3252_v48 }
 0x42e   :  { %4426 = vrcp.f32 %v3146_v47  ;;  %v4419_v52 = vpop.eup %4418  ;;  %v5337_v47 = vmul.f32 %v4415_v59, %v5180_v60  ;;  %v3220_v60 = vsel %vm402_vm2, %v3201_v62, 0.0  ;;  %v3273_v62 = vld [vmem:[#allocation5] sm:$0xff] }
 0x42f   :  { %v3108_v58 = vpop.xlane.xlu0 %3107  ;;  %4428 = vrcp.f32 %v3135_v49  ;;  %v4421_v32 = vpop.eup %4420  ;;  %v3239_v49 = vsel %vm402_vm2, %v3196_v18, 0.0  ;;  %v3204_v21 = vmul.f32 %v4419_v52, %v5245_v44  ;;  %v3197_v44 = vmul.f32 %v4417_v27, %v5223_v10 }
 0x430   :  { %v3099_v61 = vpop.xlane.xlu1 %3098  ;;  %v3148_v3 = vmul.f32 4.0, %v3108_v58  ;;  %4430 = vrcp.f32 %v3141_v25  ;;  %v4423_v40 = vpop.eup %4422  ;;  %v3226_v25 = vadd.f32 %v3225_v15, %v3224_v54  ;;  %v3219_v58 = vadd.f32 %v3218_v63, %v3217_v9 }
 0x431   :  { %v3145_v2 = vmul.f32 4.0, %v3099_v61  ;;  %v4425_v29 = vpop.eup %4424  ;;  %v3206_v54 = vmul.f32 %v4423_v40, %v5255_v22  ;;  %v3241_v59 = vsel %vm402_vm2, %v3204_v21, 0.0  ;;  %v3274_v22 = vld [vmem:[#allocation5 + $0x8] sm:$0xff]  ;;  %v3276_v40 = vld [vmem:[#allocation5 + $0x18] sm:$0xff] }
 0x432   :  { %v3228_v6 = vadd.f32 %v3227_v26, %v3226_v25  ;;  %v3200_v18 = vmul.f32 %v4425_v29, %v5225_v13  ;;  %v3245_v29 = vsel %vm402_vm2, %v5318_v5, 0.0  ;;  %v3275_v5 = vld [vmem:[#allocation5 + $0x10] sm:$0xff] }
 0x433   :  { %4432 = vrcp.f32 %v3145_v2  ;;  %v3114_v30 = vpop.xlane.xlu0 %3113  ;;  %v3255_v27 = vsel %vm402_vm2, %v3206_v54, 0.0 }
 0x434   :  { %4434 = vrcp.f32 %v3148_v3  ;;  %v3105_v0 = vpop.xlane.xlu1 %3104  ;;  %v3150_v16 = vmul.f32 4.0, %v3114_v30  ;;  %v3203_v3 = vmul.f32 %v4421_v32, %v5253_v31  ;;  %v3256_v25 = vadd.f32 %v3255_v27, %v3254_v11 }
 0x435   :  { %4436 = vrcp.f32 %v3144_v33  ;;  %v3147_v35 = vmul.f32 4.0, %v3105_v0  ;;  %v3240_v33 = vadd.f32 %v3239_v49, %v3238_v53 }
 0x436   :  { %4438 = vrcp.f32 %v3143_v1  ;;  %v3234_v10 = vsel %vm402_vm2, %v3203_v3, 0.0  ;;  %v3259_v3 = vsel %vm402_vm2, %v5330_v55, 0.0 }
 0x437   :  { %4440 = vrcp.f32 %v3147_v35  ;;  %v3242_v35 = vadd.f32 %v3241_v59, %v3240_v33 }
 0x438   :  { %4442 = vrcp.f32 %v3150_v16  ;;  %v3111_v57 = vpop.xlane.xlu1 %3110  ;;  %v4427_v61 = vpop.eup %4426 }
 0x439   :  { %v3149_v39 = vmul.f32 4.0, %v3111_v57  ;;  %v4429_v2 = vpop.eup %4428  ;;  %v3210_v34 = vmul.f32 %v4427_v61, %v5272_v43  ;;  %v3221_v43 = vadd.f32 %v3220_v60, %v3219_v58 }
 0x43a   :  { %v3120_v17 = vpop.xlane.xlu0 %3119  ;;  %v4431_v1 = vpop.eup %4430  ;;  %v3199_v63 = vmul.f32 %v4429_v2, %v5233_v28  ;;  %v4450_v28 = vld [vmem:[#allocation2 + $0x18] sm:$0xff]  ;;  %v3278_v2 = vld [vmem:[#allocation5 + $0x28] sm:$0xff] }
 0x43b   :  { %4444 = vrcp.f32 %v3149_v39  ;;  %v3152_v9 = vmul.f32 4.0, %v3120_v17  ;;  %v3229_v31 = vsel %vm402_vm2, %v3210_v34, 0.0  ;;  %v3205_v16 = vmul.f32 %v4431_v1, %v5263_v4  ;;  %v4451_v34 = vld [vmem:[#allocation2 + $0x10] sm:$0xff] }
 0x43c   :  { %v3117_v37 = vpop.xlane.xlu1 %3116  ;;  %v3230_v0 = vadd.f32 %v3229_v31, %v3228_v6  ;;  %v3266_v1 = vsel %vm402_vm2, %v5337_v47, 0.0  ;;  %v4452_v6 = vld [vmem:[#allocation2 + $0x28] sm:$0xff] }
 0x43d   :  { %v4433_v20 = vpop.eup %4432  ;;  %v3151_v14 = vmul.f32 4.0, %v3117_v37  ;;  %4446 = vrcp.f32 %v3152_v9  ;;  %v3248_v39 = vsel %vm402_vm2, %v3205_v16, 0.0  ;;  %v4455_v16 = vld [vmem:[#allocation2 + $0x30] sm:$0xff] }
 0x43e   :  { %v4435_v15 = vpop.eup %4434  ;;  %v3209_v51 = vmul.f32 %v4433_v20, %v5284_v45  ;;  %v3282_v48 = vmul.f32 %v3274_v22, %v3230_v0  ;;  %v3246_v45 = vsel %vm402_vm2, %v3197_v44, 0.0 }
 0x43f   :  { %v4437_v30 = vpop.eup %4436  ;;  %v3212_v42 = vmul.f32 %v4435_v15, %v5282_v50  ;;  %4448 = vrcp.f32 %v3151_v14  ;;  %v3235_v50 = vadd.f32 %v3234_v10, %v3233_v7 }
 0x440   :  { %v4439_v13 = vpop.eup %4438  ;;  %v3222_v52 = vsel %vm402_vm2, %v3209_v51, 0.0  ;;  %4260 = vmatmul.mubr.msk.f32.vlgmr.msra.gmra.mrb[36].mxu0 %vm402_vm2, %v3282_v48  ;;  %v3208_v38 = vmul.f32 %v4437_v30, %v5265_v8  ;;  %v3247_v8 = vadd.f32 %v3246_v45, %v3245_v29  ;;  %v4453_v51 = vld [vmem:[#allocation2 + $0x20] sm:$0xff] }
 0x441   :  { %v4441_v32 = vpop.eup %4440  ;;  %v3243_v36 = vsel %vm402_vm2, %v3212_v42, 0.0  ;;  %v3223_v49 = vadd.f32 %v3222_v52, %v3221_v43  ;;  %4268 = vmatpush3.msra.mxu0 %v4450_v28  ;;  %4269 = vmatprep.mubr.msk.f32.mxu0 %vm4560_vm1, %v4559_v19  ;;  %v4454_v42 = vld [vmem:[#allocation2 + $0x38] sm:$0xff] }
 0x442   :  { %v4443_v53 = vpop.eup %4442  ;;  %v3211_v57 = vmul.f32 %v4441_v32, %v5292_v56  ;;  %v3244_v4 = vadd.f32 %v3243_v36, %v3242_v35  ;;  %v3207_v56 = vmul.f32 %v4439_v13, %v5274_v12  ;;  %4277 = vmatprep.subr.mxu0 %v4559_v19  ;;  %v3260_v12 = vsel %vm402_vm2, %v3199_v63, 0.0 }
 0x443   :  { %v3214_v26 = vmul.f32 %v4443_v53, %v5290_v41  ;;  %v3281_v21 = vmul.f32 %v3273_v62, %v3223_v49  ;;  %v3267_v41 = vsel %vm402_vm2, %v3200_v18, 0.0  ;;  %v3249_v11 = vadd.f32 %v3248_v39, %v3247_v8  ;;  %v3277_v18 = vld [vmem:[#allocation5 + $0x20] sm:$0xff] }
 0x444   :  { %v3236_v61 = vsel %vm402_vm2, %v3211_v57, 0.0  ;;  %v3284_v58 = vmul.f32 %v3276_v40, %v3244_v4  ;;  %v3269_v44 = vsel %vm402_vm2, %v3208_v38, 0.0  ;;  %v3268_v9 = vadd.f32 %v3267_v41, %v3266_v1 }
 0x445   :  { %v4445_v7 = vpop.eup %4444  ;;  %v3257_v33 = vsel %vm402_vm2, %v3214_v26, 0.0  ;;  %4255 = vmatmul.mubr.msk.f32.vlgmr.msra.gmra.mrb[36].mxu1 %vm402_vm2, %v3281_v21  ;;  %v3237_v60 = vadd.f32 %v3236_v61, %v3235_v50  ;;  %v3261_v31 = vadd.f32 %v3260_v12, %v3259_v3 }
 0x446   :  { %v3213_v54 = vmul.f32 %v4445_v7, %v5298_v46  ;;  %4270 = vmatmul.mubr.msk.f32.vlgmr.msra.gmra.mrb[38].mxu0 %vm402_vm2, %v3284_v58  ;;  %4263 = vmatpush3.msra.mxu1 %v4451_v34  ;;  %v3258_v17 = vadd.f32 %v3257_v33, %v3256_v25  ;;  %v3262_v46 = vsel %vm402_vm2, %v3207_v56, 0.0  ;;  %v3270_v15 = vadd.f32 %v3269_v44, %v3268_v9 }
 0x447   :  { %4264 = vmatprep.mubr.msk.f32.mxu1 %vm4560_vm1, %v4559_v19  ;;  %4278 = vmatpush3.msra.mxu0 %v4452_v6  ;;  %v3283_v55 = vmul.f32 %v3275_v5, %v3237_v60  ;;  %v4447_v37 = vpop.eup %4446  ;;  %v3263_v0 = vadd.f32 %v3262_v46, %v3261_v31 }
 0x448   :  { %v3250_v20 = vsel %vm402_vm2, %v3213_v54, 0.0  ;;  %4279 = vmatprep.mubr.msk.f32.mxu0 %vm4560_vm1, %v4559_v19  ;;  %4272 = vmatprep.subr.mxu1 %v4559_v19  ;;  %v3286_v47 = vmul.f32 %v3278_v2, %v3258_v17  ;;  %v3216_v14 = vmul.f32 %v4447_v37, %v5302_v24  ;;  %v3280_v24 = vld [vmem:[#allocation5 + $0x38] sm:$0xff] }
 0x449   :  { %v4449_v59 = vpop.eup %4448  ;;  %4265 = vmatmul.mubr.msk.f32.vlgmr.msra.gmra.mrb[38].mxu1 %vm402_vm2, %v3283_v55  ;;  %v3251_v22 = vadd.f32 %v3250_v20, %v3249_v11  ;;  %4287 = vmatprep.subr.mxu0 %v4559_v19 }
 0x44a   :  { %v3215_v43 = vmul.f32 %v4449_v59, %v5304_v23  ;;  %4280 = vmatmul.mubr.msk.f32.vlgmr.msra.gmra.mrb[40].mxu0 %vm402_vm2, %v3286_v47  ;;  %4273 = vmatpush3.msra.mxu1 %v4453_v51  ;;  %v3271_v30 = vsel %vm402_vm2, %v3216_v14, 0.0  ;;  %v3279_v23 = vld [vmem:[#allocation5 + $0x30] sm:$0xff] }
 0x44b   :  { %4274 = vmatprep.mubr.msk.f32.mxu1 %vm4560_vm1, %v4559_v19  ;;  %v3285_v10 = vmul.f32 %v3277_v18, %v3251_v22  ;;  %4282 = vmatprep.subr.mxu1 %v4559_v19  ;;  %v3272_v13 = vadd.f32 %v3271_v30, %v3270_v15 }
 0x44c   :  { %v3264_v27 = vsel %vm402_vm2, %v3215_v43, 0.0  ;;  %4288 = vmatpush3.msra.mxu0 %v4454_v42  ;;  %4289 = vmatprep.mubr.msk.f32.mxu0 %vm4560_vm1, %v4559_v19 }
 0x44d   :  { %4275 = vmatmul.mubr.msk.f32.vlgmr.msra.gmra.mrb[40].mxu1 %vm402_vm2, %v3285_v10  ;;  %v3265_v35 = vadd.f32 %v3264_v27, %v3263_v0  ;;  %v3288_v52 = vmul.f32 %v3280_v24, %v3272_v13 }
 0x44e   :  { %4283 = vmatpush3.msra.mxu1 %v4455_v16  ;;  %4284 = vmatprep.mubr.msk.f32.mxu1 %vm4560_vm1, %v4559_v19 }
 0x44f   :  { %v3287_v48 = vmul.f32 %v3279_v23, %v3265_v35  ;;  %4290 = vmatmul.mubr.msk.f32.vlgmr.msra.gmra.mrb[42].mxu0 %vm402_vm2, %v3288_v52 }
 0x451   :  { %4285 = vmatmul.mubr.msk.f32.vlgmr.msra.gmra.mrb[42].mxu1 %vm402_vm2, %v3287_v48 }
 0x513   :  { %v3431_v62 = vpop.f32.mrb[36].mxu0 }
 0x514   :  { %3874 = vst.msk [vmem:[#allocation8 + $0x8] sm:$0xff] %vm214_vm0, %v3431_v62  ;;  %v4261_v32 = vpop.f32.mrb[37].mxu0 }
 0x518   :  { %v3358_v45 = vpop.f32.mrb[36].mxu1 }
 0x519   :  { %3873 = vst.msk [vmem:[#allocation8] sm:$0xff] %vm214_vm0, %v3358_v45  ;;  %v3577_v63 = vpop.f32.mrb[38].mxu0  ;;  %v4256_v36 = vpop.f32.mrb[37].mxu1 }
 0x51a   :  { %3876 = vst.msk [vmem:[#allocation8 + $0x18] sm:$0xff] %vm214_vm0, %v3577_v63  ;;  %v4271_v49 = vpop.f32.mrb[39].mxu0 }
 0x51c   :  { %v3504_v40 = vpop.f32.mrb[38].mxu1 }
 0x51d   :  { %3875 = vst.msk [vmem:[#allocation8 + $0x10] sm:$0xff] %vm214_vm0, %v3504_v40  ;;  %v3723_v19 = vpop.f32.mrb[40].mxu0  ;;  %v4266_v53 = vpop.f32.mrb[39].mxu1 }
 0x51e   :  { %3878 = vst.msk [vmem:[#allocation8 + $0x28] sm:$0xff] %vm214_vm0, %v3723_v19  ;;  %v4281_v50 = vpop.f32.mrb[41].mxu0 }
 0x520   :  { %v3650_v25 = vpop.f32.mrb[40].mxu1 }
 0x521   :  { %3877 = vst.msk [vmem:[#allocation8 + $0x20] sm:$0xff] %vm214_vm0, %v3650_v25  ;;  %v4276_v57 = vpop.f32.mrb[41].mxu1 }
 0x522   :  { %v3869_v4 = vpop.f32.mrb[42].mxu0 }
 0x523   :  { %3880 = vst.msk [vmem:[#allocation8 + $0x38] sm:$0xff] %vm214_vm0, %v3869_v4  ;;  %v4291_v38 = vpop.f32.mrb[43].mxu0 }
 0x524   :  { %v3796_v29 = vpop.f32.mrb[42].mxu1 }
 0x525   :  { %3879 = vst.msk [vmem:[#allocation8 + $0x30] sm:$0xff] %vm214_vm0, %v3796_v29  ;;  %v4286_v26 = vpop.f32.mrb[43].mxu1 }
 0x526   :  { %4533 = shalt.err (!%p4530_p0)
}
 0x527   :  { %s4534_s10 = scalar_lea.hbm %s5434_s4, 1024 }
 0x528   :  { %p4535_p1 = scmp.ne.s32.totalorder %s5434_s4, %s4534_s10  ;;  %p4538_p2 = scmp.lt.u32.totalorder %s4534_s10, %s5434_s4 }
 0x52a   :  { %p4540_p3 = pnand %p4538_p2, %p4535_p1 }
 0x52c   :  { %4543 = shalt.err (!%p4540_p3)
}
 0x52d   :  { %3892 = dma.vmem_to_hbm [thread:$0]  %s3887_s6, 1024, %s5434_s4, [#allocation4], %s4552_s27, %s4552_s27, %s4553_s28  }
 0x52e   :  { %4548 = dma.done.wait [#allocation4], 1024  }
 0x52f   :  { %4549 = vsyncadd [#allocation4], 4294966272 }
 0x530   :  { %3896 = vsyncpa [#allocation3], 1 }
 0x531   :  { %3897 = vsyncpa [#allocation6], 1 }
 0x532   :  { %3898 = vsyncpa [#allocation4], 1 }

</bundles_post_ra>
